<compile_context>
chip_gen: v7x
topology: tpu7x:2x2x1
jax: 0.10.0
libtpu: 0.0.40
codegen_flags: <defaults>
</compile_context>

<pallas_src>
import functools

import jax
import jax.numpy as jnp
from jax.experimental import pallas as pl
from jax.experimental.pallas import tpu as pltpu


def _residual_attention_kernel(x_ref, wq_ref, wkv_ref, bq_ref, bkv_ref,
                               wout_ref, bout_ref, o_ref, *, heads):
    n = x_ref.shape[1]
    dim = x_ref.shape[2]
    tq = o_ref.shape[1]
    d = dim // heads
    cdt = wq_ref.dtype              # MXU-input dtype (bf16/f32); accum is f32

    # q-tile window of x (second grid axis); full x stays resident for K/V.
    q_start = pl.multiple_of(pl.program_id(1) * tq, 8)
    x_full = x_ref[0]                                   # (n, dim)  f32
    xq = x_ref[0, pl.ds(q_start, tq), :]                # (tq, dim) f32

    # One cast per operand, right before MXU use (v5e: no bf16 VPU path).
    xc = x_full.astype(cdt)
    xqc = xq.astype(cdt)

    # ---- projections: full-width 2-D GEMMs (no x broadcast over heads) ----
    # Softmax scale is pre-folded into wq/bq by the wrapper.
    q2 = jnp.dot(xqc, wq_ref[...],
                 preferred_element_type=jnp.float32) + bq_ref[...]   # (tq, dim)
    # K|V as one (dim, 2*dim) GEMM, columns packed [K_all | V_all] so the
    # split below lands on a dim boundary.
    kv = jnp.dot(xc, wkv_ref[...],
                 preferred_element_type=jnp.float32) + bkv_ref[...]  # (n, 2*dim)
    k2 = kv[:, :dim]                                    # (n, dim)
    v2 = kv[:, dim:]                                    # (n, dim)

    q2c = q2.astype(cdt)
    k2c = k2.astype(cdt)
    v2c = v2.astype(cdt)

    # ---- per-head attention core (static unrolled; each head is a 2-D MXU
    # call -- a head-batched einsum serializes into the same MXU work).  Only
    # a (tq, n) f32 score tile is live per head.
    ctx_heads = []
    for h in range(heads):
        lo = h * d
        qh = q2c[:, lo:lo + d]                          # (tq, d)
        kh = k2c[:, lo:lo + d]                          # (n, d)
        vh = v2c[:, lo:lo + d]                          # (n, d)
        # q.k^T via contraction of the last axes (no explicit transpose).
        s = jnp.einsum('qd,kd->qk', qh, kh,
                       preferred_element_type=jnp.float32)            # (tq, n)
        s = s - jnp.max(s, axis=-1, keepdims=True)
        e = jnp.exp(s)
        p = e * pl.reciprocal(jnp.sum(e, axis=-1, keepdims=True), approx=True)
        ctx_heads.append(
            jnp.dot(p.astype(cdt), vh, preferred_element_type=jnp.float32))

    # ---- head merge + output projection: one deep GEMM (K = dim); the
    # (heads, n, dim) partial tensor is never materialized.
    merged = jnp.concatenate(ctx_heads, axis=-1)        # (tq, dim), (h d) order
    out = jnp.dot(merged.astype(cdt), wout_ref[...],
                  preferred_element_type=jnp.float32)
    out = out + bout_ref[...] + xq                      # bias + residual (f32)

    o_ref[0] = out.astype(o_ref.dtype)


def _build_call(b, n, dim, heads, tq, out_dtype, cost, vmem_limit,
                buffered_weights):
    kernel = functools.partial(_residual_attention_kernel, heads=heads)
    # Weights/biases never change across the grid: constant index maps, and
    # (when supported) single buffering to halve their VMEM footprint.
    wkw = {"pipeline_mode": pl.Buffered(1)} if buffered_weights else {}
    in_specs = [
        pl.BlockSpec((1, n, dim), lambda i, q: (i, 0, 0)),          # x (full seq)
        pl.BlockSpec((dim, dim), lambda i, q: (0, 0), **wkw),       # Wq^T (scaled)
        pl.BlockSpec((dim, 2 * dim), lambda i, q: (0, 0), **wkw),   # [Wk^T | Wv^T]
        pl.BlockSpec((1, dim), lambda i, q: (0, 0), **wkw),         # bq (scaled)
        pl.BlockSpec((1, 2 * dim), lambda i, q: (0, 0), **wkw),     # [bk | bv]
        pl.BlockSpec((dim, dim), lambda i, q: (0, 0), **wkw),       # Wout^T
        pl.BlockSpec((1, dim), lambda i, q: (0, 0), **wkw),         # bout
    ]
    return pl.pallas_call(
        kernel,
        out_shape=jax.ShapeDtypeStruct((b, n, dim), out_dtype),
        grid=(b, n // tq),
        in_specs=in_specs,
        out_specs=pl.BlockSpec((1, tq, dim), lambda i, q: (i, q, 0)),
        compiler_params=pltpu.CompilerParams(
            dimension_semantics=("parallel", "parallel"),
            vmem_limit_bytes=vmem_limit),
        cost_estimate=cost,
    )


def residual_attention_forward(x, w_qkv, b_qkv, w_out, b_out, *, heads,
                               compute_dtype=jnp.bfloat16, tq=None):
    b, n, dim = x.shape
    assert dim % heads == 0
    d = dim // heads
    scale = dim ** (-0.5)    # NOTE: vt.py Attention scales by full dim, not d.

    # q-tile size: must divide n and be a multiple of 8 (sublane rule).
    if tq is None:
        tq = n
        for cand in (512, 256, 128):
            if n % cand == 0:
                tq = cand
                break
    assert n % tq == 0 and (tq == n or tq % 8 == 0)

    # ---- one-time layout plumbing in the wrapper (not per grid step) ------
    # to_qkv weight rows are laid out (qkv, head, d): rows [0:dim]=Q,
    # [dim:2dim]=K, [2dim:3dim]=V, each head-major.  Pre-transpose; fold the
    # softmax scale into the Q weight/bias; pack K|V columns contiguously.
    wq_t = (w_qkv[0:dim] * scale).T.astype(compute_dtype)            # (dim, dim)
    wkv_t = jnp.concatenate([w_qkv[dim:2 * dim].T, w_qkv[2 * dim:].T],
                            axis=1).astype(compute_dtype)            # (dim, 2*dim)
    bq_r = (b_qkv[0:dim] * scale).reshape(1, dim).astype(jnp.float32)
    bkv_r = b_qkv[dim:].reshape(1, 2 * dim).astype(jnp.float32)
    wout_t = w_out.T.astype(compute_dtype)                           # (dim, dim)
    bout_r = b_out.reshape(1, dim).astype(jnp.float32)

    itemsize = jnp.dtype(compute_dtype).itemsize
    flops = b * (2 * n * dim * dim            # Q projection
                 + 2 * n * dim * 2 * dim      # K|V projection
                 + 4 * heads * n * n * d      # scores + attn @ V
                 + 2 * n * dim * dim)         # output projection
    cost = pl.CostEstimate(
        flops=int(flops),
        transcendentals=int(b * heads * n * n),
        bytes_accessed=int(2 * b * n * dim * 4
                           + (wq_t.size + wkv_t.size + wout_t.size) * itemsize
                           + (bq_r.size + bkv_r.size + bout_r.size) * 4))

    # VMEM budget: weights (x buffering) + x/out blocks (double-buffered) +
    # f32 intermediates, with ~2x headroom; capped at v7x physical VMEM.
    wbytes = ((wq_t.size + wkv_t.size + wout_t.size) * itemsize
              + (bq_r.size + bkv_r.size + bout_r.size) * 4)
    inter = 4 * (3 * n * dim + 2 * n * dim + 2 * tq * n + 2 * tq * dim)
    budget = 2 * wbytes + 2 * (n * dim * 4 + tq * dim * 4) + 2 * inter
    vmem_limit = int(min(64 * 2 ** 20, max(32 * 2 ** 20, budget)))

    args = (x, wq_t, wkv_t, bq_r, bkv_r, wout_t, bout_r)
    try:
        out = _build_call(b, n, dim, heads, tq, x.dtype, cost, vmem_limit,
                          buffered_weights=True)(*args)
        return jax.block_until_ready(out)
    except Exception:
        # pipeline_mode=pl.Buffered(1) not supported on this JAX/Mosaic
        # version -> fall back to default (double) buffering of the weights.
        out = _build_call(b, n, dim, heads, tq, x.dtype, cost, vmem_limit,
                          buffered_weights=False)(*args)
        return jax.block_until_ready(out)


def _xavier_uniform(key, out_features, in_features, dtype=jnp.float32):
    bound = (6.0 / (in_features + out_features)) ** 0.5
    return jax.random.uniform(key, (out_features, in_features),
                              minval=-bound, maxval=bound, dtype=dtype)


def _reference_forward(x, w_qkv, b_qkv, w_out, b_out, heads):
    """Pure-JAX mirror of Residual(Attention) (mask=None, eval mode)."""
    b, n, dim = x.shape
    d = dim // heads
    scale = dim ** (-0.5)
    qkv = x @ w_qkv.T + b_qkv                                 # (b, n, 3*dim)
    qkv = qkv.reshape(b, n, 3, heads, d)
    q = jnp.transpose(qkv[:, :, 0], (0, 2, 1, 3))             # (b, h, n, d)
    k = jnp.transpose(qkv[:, :, 1], (0, 2, 1, 3))
    v = jnp.transpose(qkv[:, :, 2], (0, 2, 1, 3))
    dots = jnp.einsum('bhid,bhjd->bhij', q, k) * scale
    attn = jax.nn.softmax(dots, axis=-1)
    out = jnp.einsum('bhij,bhjd->bhid', attn, v)
    out = jnp.transpose(out, (0, 2, 1, 3)).reshape(b, n, dim)
    return out @ w_out.T + b_out + x                          # Residual: fn(x)+x


if __name__ == "__main__":
    B, N, DIM, HEADS, TQ = 2, 16, 32, 8, 8   # TQ=8 -> grid (2, 2), 2 q-tiles

    key = jax.random.PRNGKey(0)
    kx, kw1, kw2, kb1, kb2 = jax.random.split(key, 5)

    x = jax.random.normal(kx, (B, N, DIM), dtype=jnp.float32)

    # to_qkv: Linear(dim, 3*dim), xavier_uniform weight; vt.py zero-inits the
    # biases, but small non-zero biases are used here to exercise that path.
    w_qkv = _xavier_uniform(kw1, 3 * DIM, DIM)
    b_qkv = 0.1 * jax.random.normal(kb1, (3 * DIM,), dtype=jnp.float32)
    # nn1: Linear(dim, dim), xavier_uniform weight.
    w_out = _xavier_uniform(kw2, DIM, DIM)
    b_out = 0.1 * jax.random.normal(kb2, (DIM,), dtype=jnp.float32)

    ref = _reference_forward(x, w_qkv, b_qkv, w_out, b_out, HEADS)

    # f32 MXU-input path: tight check (approx reciprocal is the only approx).
    out_f32 = residual_attention_forward(x, w_qkv, b_qkv, w_out, b_out,
                                         heads=HEADS, tq=TQ,
                                         compute_dtype=jnp.float32)
    out_f32 = jax.block_until_ready(out_f32)
    assert out_f32.shape == (B, N, DIM)
    assert jnp.allclose(out_f32, ref, atol=5e-3, rtol=5e-3), \
        "f32 mismatch vs reference"

    # bf16 MXU-input path (f32 accumulation): looser tolerance.
    out_bf16 = residual_attention_forward(x, w_qkv, b_qkv, w_out, b_out,
                                          heads=HEADS, tq=TQ,
                                          compute_dtype=jnp.bfloat16)
    out_bf16 = jax.block_until_ready(out_bf16)
    assert jnp.allclose(out_bf16, ref, atol=6e-2, rtol=6e-2), \
        "bf16 mismatch vs reference"

    print("KERNEL_OK")
</pallas_src>

<mosaic_0001>
module attributes {stable_mosaic.version = 11 : i64} {
  func.func @_residual_attention_kernel(%arg0: i32, %arg1: i32, %arg2: memref<1x16x32xf32, #tpu.memory_space<vmem>>, %arg3: memref<32x32xf32, #tpu.memory_space<vmem>>, %arg4: memref<32x64xf32, #tpu.memory_space<vmem>>, %arg5: memref<1x32xf32, #tpu.memory_space<vmem>>, %arg6: memref<1x64xf32, #tpu.memory_space<vmem>>, %arg7: memref<32x32xf32, #tpu.memory_space<vmem>>, %arg8: memref<1x32xf32, #tpu.memory_space<vmem>>, %arg9: memref<1x8x32xf32, #tpu.memory_space<vmem>>) attributes {dimension_semantics = [#tpu.dimension_semantics<parallel>, #tpu.dimension_semantics<parallel>], iteration_bounds = array<i64: 2, 2>, scalar_prefetch = 0 : i64, scratch_operands = 0 : i64, tpu.core_type = #tpu.core_type<tc>, window_params = [{transform_indices = @transform_0, window_bounds = array<i64: 1, 16, 32>}, {pipeline_mode = #tpu.pipeline_mode<synchronous>, transform_indices = @transform_1, window_bounds = array<i64: 32, 32>}, {pipeline_mode = #tpu.pipeline_mode<synchronous>, transform_indices = @transform_2, window_bounds = array<i64: 32, 64>}, {pipeline_mode = #tpu.pipeline_mode<synchronous>, transform_indices = @transform_3, window_bounds = array<i64: 1, 32>}, {pipeline_mode = #tpu.pipeline_mode<synchronous>, transform_indices = @transform_4, window_bounds = array<i64: 1, 64>}, {pipeline_mode = #tpu.pipeline_mode<synchronous>, transform_indices = @transform_5, window_bounds = array<i64: 32, 32>}, {pipeline_mode = #tpu.pipeline_mode<synchronous>, transform_indices = @transform_6, window_bounds = array<i64: 1, 32>}, {transform_indices = @transform_7, window_bounds = array<i64: 1, 8, 32>}]} {
    %c8_i32 = arith.constant 8 : i32
    %0 = arith.muli %arg1, %c8_i32 : i32
    %1 = tpu.assume_multiple %0, 8 : i32
    %c0 = arith.constant 0 : index
    %c0_0 = arith.constant 0 : index
    %c0_1 = arith.constant 0 : index
    %2 = vector.load %arg2[%c0, %c0_0, %c0_1] : memref<1x16x32xf32, #tpu.memory_space<vmem>>, vector<1x16x32xf32>
    %3 = vector.shape_cast %2 : vector<1x16x32xf32> to vector<16x32xf32>
    %c0_2 = arith.constant 0 : index
    %4 = arith.index_cast %1 : i32 to index
    %c0_3 = arith.constant 0 : index
    %5 = vector.load %arg2[%c0_2, %4, %c0_3] : memref<1x16x32xf32, #tpu.memory_space<vmem>>, vector<1x8x32xf32>
    %6 = vector.shape_cast %5 : vector<1x8x32xf32> to vector<8x32xf32>
    %c0_4 = arith.constant 0 : index
    %c0_5 = arith.constant 0 : index
    %7 = vector.load %arg3[%c0_4, %c0_5] : memref<32x32xf32, #tpu.memory_space<vmem>>, vector<32x32xf32>
    %cst = arith.constant dense<0.000000e+00> : vector<8x32xf32>
    %8 = tpu.matmul %6, %7, %cst {dimension_numbers = #tpu.dot_dimension_numbers<[1], [0], [0], [1], [0, 0, 1, 1], [], []>} : vector<8x32xf32>, vector<32x32xf32>, vector<8x32xf32> -> vector<8x32xf32>
    %c0_6 = arith.constant 0 : index
    %c0_7 = arith.constant 0 : index
    %9 = vector.load %arg5[%c0_6, %c0_7] : memref<1x32xf32, #tpu.memory_space<vmem>>, vector<1x32xf32>
    %10 = vector.broadcast %9 : vector<1x32xf32> to vector<8x32xf32>
    %11 = arith.addf %8, %10 : vector<8x32xf32>
    %c0_8 = arith.constant 0 : index
    %c0_9 = arith.constant 0 : index
    %12 = vector.load %arg4[%c0_8, %c0_9] : memref<32x64xf32, #tpu.memory_space<vmem>>, vector<32x64xf32>
    %cst_10 = arith.constant dense<0.000000e+00> : vector<16x64xf32>
    %13 = tpu.matmul %3, %12, %cst_10 {dimension_numbers = #tpu.dot_dimension_numbers<[1], [0], [0], [1], [0, 0, 1, 1], [], []>} : vector<16x32xf32>, vector<32x64xf32>, vector<16x64xf32> -> vector<16x64xf32>
    %c0_11 = arith.constant 0 : index
    %c0_12 = arith.constant 0 : index
    %14 = vector.load %arg6[%c0_11, %c0_12] : memref<1x64xf32, #tpu.memory_space<vmem>>, vector<1x64xf32>
    %15 = vector.broadcast %14 : vector<1x64xf32> to vector<16x64xf32>
    %16 = arith.addf %13, %15 : vector<16x64xf32>
    %17 = vector.extract_strided_slice %16 {offsets = [0, 0], sizes = [16, 32], strides = [1, 1]} : vector<16x64xf32> to vector<16x32xf32>
    %18 = vector.extract_strided_slice %16 {offsets = [0, 32], sizes = [16, 32], strides = [1, 1]} : vector<16x64xf32> to vector<16x32xf32>
    %19 = vector.extract_strided_slice %11 {offsets = [0, 0], sizes = [8, 4], strides = [1, 1]} : vector<8x32xf32> to vector<8x4xf32>
    %20 = vector.extract_strided_slice %17 {offsets = [0, 0], sizes = [16, 4], strides = [1, 1]} : vector<16x32xf32> to vector<16x4xf32>
    %21 = vector.extract_strided_slice %18 {offsets = [0, 0], sizes = [16, 4], strides = [1, 1]} : vector<16x32xf32> to vector<16x4xf32>
    "tpu.trace_start"() <{level = 10 : i32, message = "qd,kd->qk"}> : () -> ()
    %cst_13 = arith.constant dense<0.000000e+00> : vector<8x16xf32>
    %22 = tpu.matmul %19, %20, %cst_13 {dimension_numbers = #tpu.dot_dimension_numbers<[1], [1], [0], [0], [0, 0, 1, 0], [], []>} : vector<8x4xf32>, vector<16x4xf32>, vector<8x16xf32> -> vector<8x16xf32>
    "tpu.trace_stop"() : () -> ()
    %cst_14 = arith.constant dense<0xFF800000> : vector<8xf32>
    %23 = vector.multi_reduction <maximumf>, %22, %cst_14 [1] : vector<8x16xf32> to vector<8xf32>
    %24 = vector.shape_cast %23 : vector<8xf32> to vector<8x1xf32>
    %25 = vector.broadcast %24 : vector<8x1xf32> to vector<8x16xf32>
    %26 = arith.subf %22, %25 : vector<8x16xf32>
    %27 = math.exp %26 : vector<8x16xf32>
    %cst_15 = arith.constant dense<0.000000e+00> : vector<8xf32>
    %28 = vector.multi_reduction <add>, %27, %cst_15 [1] : vector<8x16xf32> to vector<8xf32>
    %29 = vector.shape_cast %28 : vector<8xf32> to vector<8x1xf32>
    %30 = tpu.reciprocal %29 {approx = true} : vector<8x1xf32> -> vector<8x1xf32>
    %31 = vector.broadcast %30 : vector<8x1xf32> to vector<8x16xf32>
    %32 = arith.mulf %27, %31 : vector<8x16xf32>
    %cst_16 = arith.constant dense<0.000000e+00> : vector<8x4xf32>
    %33 = tpu.matmul %32, %21, %cst_16 {dimension_numbers = #tpu.dot_dimension_numbers<[1], [0], [0], [1], [0, 0, 1, 1], [], []>} : vector<8x16xf32>, vector<16x4xf32>, vector<8x4xf32> -> vector<8x4xf32>
    %34 = vector.extract_strided_slice %11 {offsets = [0, 4], sizes = [8, 4], strides = [1, 1]} : vector<8x32xf32> to vector<8x4xf32>
    %35 = vector.extract_strided_slice %17 {offsets = [0, 4], sizes = [16, 4], strides = [1, 1]} : vector<16x32xf32> to vector<16x4xf32>
    %36 = vector.extract_strided_slice %18 {offsets = [0, 4], sizes = [16, 4], strides = [1, 1]} : vector<16x32xf32> to vector<16x4xf32>
    "tpu.trace_start"() <{level = 10 : i32, message = "qd,kd->qk"}> : () -> ()
    %cst_17 = arith.constant dense<0.000000e+00> : vector<8x16xf32>
    %37 = tpu.matmul %34, %35, %cst_17 {dimension_numbers = #tpu.dot_dimension_numbers<[1], [1], [0], [0], [0, 0, 1, 0], [], []>} : vector<8x4xf32>, vector<16x4xf32>, vector<8x16xf32> -> vector<8x16xf32>
    "tpu.trace_stop"() : () -> ()
    %cst_18 = arith.constant dense<0xFF800000> : vector<8xf32>
    %38 = vector.multi_reduction <maximumf>, %37, %cst_18 [1] : vector<8x16xf32> to vector<8xf32>
    %39 = vector.shape_cast %38 : vector<8xf32> to vector<8x1xf32>
    %40 = vector.broadcast %39 : vector<8x1xf32> to vector<8x16xf32>
    %41 = arith.subf %37, %40 : vector<8x16xf32>
    %42 = math.exp %41 : vector<8x16xf32>
    %cst_19 = arith.constant dense<0.000000e+00> : vector<8xf32>
    %43 = vector.multi_reduction <add>, %42, %cst_19 [1] : vector<8x16xf32> to vector<8xf32>
    %44 = vector.shape_cast %43 : vector<8xf32> to vector<8x1xf32>
    %45 = tpu.reciprocal %44 {approx = true} : vector<8x1xf32> -> vector<8x1xf32>
    %46 = vector.broadcast %45 : vector<8x1xf32> to vector<8x16xf32>
    %47 = arith.mulf %42, %46 : vector<8x16xf32>
    %cst_20 = arith.constant dense<0.000000e+00> : vector<8x4xf32>
    %48 = tpu.matmul %47, %36, %cst_20 {dimension_numbers = #tpu.dot_dimension_numbers<[1], [0], [0], [1], [0, 0, 1, 1], [], []>} : vector<8x16xf32>, vector<16x4xf32>, vector<8x4xf32> -> vector<8x4xf32>
    %49 = vector.extract_strided_slice %11 {offsets = [0, 8], sizes = [8, 4], strides = [1, 1]} : vector<8x32xf32> to vector<8x4xf32>
    %50 = vector.extract_strided_slice %17 {offsets = [0, 8], sizes = [16, 4], strides = [1, 1]} : vector<16x32xf32> to vector<16x4xf32>
    %51 = vector.extract_strided_slice %18 {offsets = [0, 8], sizes = [16, 4], strides = [1, 1]} : vector<16x32xf32> to vector<16x4xf32>
    "tpu.trace_start"() <{level = 10 : i32, message = "qd,kd->qk"}> : () -> ()
    %cst_21 = arith.constant dense<0.000000e+00> : vector<8x16xf32>
    %52 = tpu.matmul %49, %50, %cst_21 {dimension_numbers = #tpu.dot_dimension_numbers<[1], [1], [0], [0], [0, 0, 1, 0], [], []>} : vector<8x4xf32>, vector<16x4xf32>, vector<8x16xf32> -> vector<8x16xf32>
    "tpu.trace_stop"() : () -> ()
    %cst_22 = arith.constant dense<0xFF800000> : vector<8xf32>
    %53 = vector.multi_reduction <maximumf>, %52, %cst_22 [1] : vector<8x16xf32> to vector<8xf32>
    %54 = vector.shape_cast %53 : vector<8xf32> to vector<8x1xf32>
    %55 = vector.broadcast %54 : vector<8x1xf32> to vector<8x16xf32>
    %56 = arith.subf %52, %55 : vector<8x16xf32>
    %57 = math.exp %56 : vector<8x16xf32>
    %cst_23 = arith.constant dense<0.000000e+00> : vector<8xf32>
    %58 = vector.multi_reduction <add>, %57, %cst_23 [1] : vector<8x16xf32> to vector<8xf32>
    %59 = vector.shape_cast %58 : vector<8xf32> to vector<8x1xf32>
    %60 = tpu.reciprocal %59 {approx = true} : vector<8x1xf32> -> vector<8x1xf32>
    %61 = vector.broadcast %60 : vector<8x1xf32> to vector<8x16xf32>
    %62 = arith.mulf %57, %61 : vector<8x16xf32>
    %cst_24 = arith.constant dense<0.000000e+00> : vector<8x4xf32>
    %63 = tpu.matmul %62, %51, %cst_24 {dimension_numbers = #tpu.dot_dimension_numbers<[1], [0], [0], [1], [0, 0, 1, 1], [], []>} : vector<8x16xf32>, vector<16x4xf32>, vector<8x4xf32> -> vector<8x4xf32>
    %64 = vector.extract_strided_slice %11 {offsets = [0, 12], sizes = [8, 4], strides = [1, 1]} : vector<8x32xf32> to vector<8x4xf32>
    %65 = vector.extract_strided_slice %17 {offsets = [0, 12], sizes = [16, 4], strides = [1, 1]} : vector<16x32xf32> to vector<16x4xf32>
    %66 = vector.extract_strided_slice %18 {offsets = [0, 12], sizes = [16, 4], strides = [1, 1]} : vector<16x32xf32> to vector<16x4xf32>
    "tpu.trace_start"() <{level = 10 : i32, message = "qd,kd->qk"}> : () -> ()
    %cst_25 = arith.constant dense<0.000000e+00> : vector<8x16xf32>
    %67 = tpu.matmul %64, %65, %cst_25 {dimension_numbers = #tpu.dot_dimension_numbers<[1], [1], [0], [0], [0, 0, 1, 0], [], []>} : vector<8x4xf32>, vector<16x4xf32>, vector<8x16xf32> -> vector<8x16xf32>
    "tpu.trace_stop"() : () -> ()
    %cst_26 = arith.constant dense<0xFF800000> : vector<8xf32>
    %68 = vector.multi_reduction <maximumf>, %67, %cst_26 [1] : vector<8x16xf32> to vector<8xf32>
    %69 = vector.shape_cast %68 : vector<8xf32> to vector<8x1xf32>
    %70 = vector.broadcast %69 : vector<8x1xf32> to vector<8x16xf32>
    %71 = arith.subf %67, %70 : vector<8x16xf32>
    %72 = math.exp %71 : vector<8x16xf32>
    %cst_27 = arith.constant dense<0.000000e+00> : vector<8xf32>
    %73 = vector.multi_reduction <add>, %72, %cst_27 [1] : vector<8x16xf32> to vector<8xf32>
    %74 = vector.shape_cast %73 : vector<8xf32> to vector<8x1xf32>
    %75 = tpu.reciprocal %74 {approx = true} : vector<8x1xf32> -> vector<8x1xf32>
    %76 = vector.broadcast %75 : vector<8x1xf32> to vector<8x16xf32>
    %77 = arith.mulf %72, %76 : vector<8x16xf32>
    %cst_28 = arith.constant dense<0.000000e+00> : vector<8x4xf32>
    %78 = tpu.matmul %77, %66, %cst_28 {dimension_numbers = #tpu.dot_dimension_numbers<[1], [0], [0], [1], [0, 0, 1, 1], [], []>} : vector<8x16xf32>, vector<16x4xf32>, vector<8x4xf32> -> vector<8x4xf32>
    %79 = vector.extract_strided_slice %11 {offsets = [0, 16], sizes = [8, 4], strides = [1, 1]} : vector<8x32xf32> to vector<8x4xf32>
    %80 = vector.extract_strided_slice %17 {offsets = [0, 16], sizes = [16, 4], strides = [1, 1]} : vector<16x32xf32> to vector<16x4xf32>
    %81 = vector.extract_strided_slice %18 {offsets = [0, 16], sizes = [16, 4], strides = [1, 1]} : vector<16x32xf32> to vector<16x4xf32>
    "tpu.trace_start"() <{level = 10 : i32, message = "qd,kd->qk"}> : () -> ()
    %cst_29 = arith.constant dense<0.000000e+00> : vector<8x16xf32>
    %82 = tpu.matmul %79, %80, %cst_29 {dimension_numbers = #tpu.dot_dimension_numbers<[1], [1], [0], [0], [0, 0, 1, 0], [], []>} : vector<8x4xf32>, vector<16x4xf32>, vector<8x16xf32> -> vector<8x16xf32>
    "tpu.trace_stop"() : () -> ()
    %cst_30 = arith.constant dense<0xFF800000> : vector<8xf32>
    %83 = vector.multi_reduction <maximumf>, %82, %cst_30 [1] : vector<8x16xf32> to vector<8xf32>
    %84 = vector.shape_cast %83 : vector<8xf32> to vector<8x1xf32>
    %85 = vector.broadcast %84 : vector<8x1xf32> to vector<8x16xf32>
    %86 = arith.subf %82, %85 : vector<8x16xf32>
    %87 = math.exp %86 : vector<8x16xf32>
    %cst_31 = arith.constant dense<0.000000e+00> : vector<8xf32>
    %88 = vector.multi_reduction <add>, %87, %cst_31 [1] : vector<8x16xf32> to vector<8xf32>
    %89 = vector.shape_cast %88 : vector<8xf32> to vector<8x1xf32>
    %90 = tpu.reciprocal %89 {approx = true} : vector<8x1xf32> -> vector<8x1xf32>
    %91 = vector.broadcast %90 : vector<8x1xf32> to vector<8x16xf32>
    %92 = arith.mulf %87, %91 : vector<8x16xf32>
    %cst_32 = arith.constant dense<0.000000e+00> : vector<8x4xf32>
    %93 = tpu.matmul %92, %81, %cst_32 {dimension_numbers = #tpu.dot_dimension_numbers<[1], [0], [0], [1], [0, 0, 1, 1], [], []>} : vector<8x16xf32>, vector<16x4xf32>, vector<8x4xf32> -> vector<8x4xf32>
    %94 = vector.extract_strided_slice %11 {offsets = [0, 20], sizes = [8, 4], strides = [1, 1]} : vector<8x32xf32> to vector<8x4xf32>
    %95 = vector.extract_strided_slice %17 {offsets = [0, 20], sizes = [16, 4], strides = [1, 1]} : vector<16x32xf32> to vector<16x4xf32>
    %96 = vector.extract_strided_slice %18 {offsets = [0, 20], sizes = [16, 4], strides = [1, 1]} : vector<16x32xf32> to vector<16x4xf32>
    "tpu.trace_start"() <{level = 10 : i32, message = "qd,kd->qk"}> : () -> ()
    %cst_33 = arith.constant dense<0.000000e+00> : vector<8x16xf32>
    %97 = tpu.matmul %94, %95, %cst_33 {dimension_numbers = #tpu.dot_dimension_numbers<[1], [1], [0], [0], [0, 0, 1, 0], [], []>} : vector<8x4xf32>, vector<16x4xf32>, vector<8x16xf32> -> vector<8x16xf32>
    "tpu.trace_stop"() : () -> ()
    %cst_34 = arith.constant dense<0xFF800000> : vector<8xf32>
    %98 = vector.multi_reduction <maximumf>, %97, %cst_34 [1] : vector<8x16xf32> to vector<8xf32>
    %99 = vector.shape_cast %98 : vector<8xf32> to vector<8x1xf32>
    %100 = vector.broadcast %99 : vector<8x1xf32> to vector<8x16xf32>
    %101 = arith.subf %97, %100 : vector<8x16xf32>
    %102 = math.exp %101 : vector<8x16xf32>
    %cst_35 = arith.constant dense<0.000000e+00> : vector<8xf32>
    %103 = vector.multi_reduction <add>, %102, %cst_35 [1] : vector<8x16xf32> to vector<8xf32>
    %104 = vector.shape_cast %103 : vector<8xf32> to vector<8x1xf32>
    %105 = tpu.reciprocal %104 {approx = true} : vector<8x1xf32> -> vector<8x1xf32>
    %106 = vector.broadcast %105 : vector<8x1xf32> to vector<8x16xf32>
    %107 = arith.mulf %102, %106 : vector<8x16xf32>
    %cst_36 = arith.constant dense<0.000000e+00> : vector<8x4xf32>
    %108 = tpu.matmul %107, %96, %cst_36 {dimension_numbers = #tpu.dot_dimension_numbers<[1], [0], [0], [1], [0, 0, 1, 1], [], []>} : vector<8x16xf32>, vector<16x4xf32>, vector<8x4xf32> -> vector<8x4xf32>
    %109 = vector.extract_strided_slice %11 {offsets = [0, 24], sizes = [8, 4], strides = [1, 1]} : vector<8x32xf32> to vector<8x4xf32>
    %110 = vector.extract_strided_slice %17 {offsets = [0, 24], sizes = [16, 4], strides = [1, 1]} : vector<16x32xf32> to vector<16x4xf32>
    %111 = vector.extract_strided_slice %18 {offsets = [0, 24], sizes = [16, 4], strides = [1, 1]} : vector<16x32xf32> to vector<16x4xf32>
    "tpu.trace_start"() <{level = 10 : i32, message = "qd,kd->qk"}> : () -> ()
    %cst_37 = arith.constant dense<0.000000e+00> : vector<8x16xf32>
    %112 = tpu.matmul %109, %110, %cst_37 {dimension_numbers = #tpu.dot_dimension_numbers<[1], [1], [0], [0], [0, 0, 1, 0], [], []>} : vector<8x4xf32>, vector<16x4xf32>, vector<8x16xf32> -> vector<8x16xf32>
    "tpu.trace_stop"() : () -> ()
    %cst_38 = arith.constant dense<0xFF800000> : vector<8xf32>
    %113 = vector.multi_reduction <maximumf>, %112, %cst_38 [1] : vector<8x16xf32> to vector<8xf32>
    %114 = vector.shape_cast %113 : vector<8xf32> to vector<8x1xf32>
    %115 = vector.broadcast %114 : vector<8x1xf32> to vector<8x16xf32>
    %116 = arith.subf %112, %115 : vector<8x16xf32>
    %117 = math.exp %116 : vector<8x16xf32>
    %cst_39 = arith.constant dense<0.000000e+00> : vector<8xf32>
    %118 = vector.multi_reduction <add>, %117, %cst_39 [1] : vector<8x16xf32> to vector<8xf32>
    %119 = vector.shape_cast %118 : vector<8xf32> to vector<8x1xf32>
    %120 = tpu.reciprocal %119 {approx = true} : vector<8x1xf32> -> vector<8x1xf32>
    %121 = vector.broadcast %120 : vector<8x1xf32> to vector<8x16xf32>
    %122 = arith.mulf %117, %121 : vector<8x16xf32>
    %cst_40 = arith.constant dense<0.000000e+00> : vector<8x4xf32>
    %123 = tpu.matmul %122, %111, %cst_40 {dimension_numbers = #tpu.dot_dimension_numbers<[1], [0], [0], [1], [0, 0, 1, 1], [], []>} : vector<8x16xf32>, vector<16x4xf32>, vector<8x4xf32> -> vector<8x4xf32>
    %124 = vector.extract_strided_slice %11 {offsets = [0, 28], sizes = [8, 4], strides = [1, 1]} : vector<8x32xf32> to vector<8x4xf32>
    %125 = vector.extract_strided_slice %17 {offsets = [0, 28], sizes = [16, 4], strides = [1, 1]} : vector<16x32xf32> to vector<16x4xf32>
    %126 = vector.extract_strided_slice %18 {offsets = [0, 28], sizes = [16, 4], strides = [1, 1]} : vector<16x32xf32> to vector<16x4xf32>
    "tpu.trace_start"() <{level = 10 : i32, message = "qd,kd->qk"}> : () -> ()
    %cst_41 = arith.constant dense<0.000000e+00> : vector<8x16xf32>
    %127 = tpu.matmul %124, %125, %cst_41 {dimension_numbers = #tpu.dot_dimension_numbers<[1], [1], [0], [0], [0, 0, 1, 0], [], []>} : vector<8x4xf32>, vector<16x4xf32>, vector<8x16xf32> -> vector<8x16xf32>
    "tpu.trace_stop"() : () -> ()
    %cst_42 = arith.constant dense<0xFF800000> : vector<8xf32>
    %128 = vector.multi_reduction <maximumf>, %127, %cst_42 [1] : vector<8x16xf32> to vector<8xf32>
    %129 = vector.shape_cast %128 : vector<8xf32> to vector<8x1xf32>
    %130 = vector.broadcast %129 : vector<8x1xf32> to vector<8x16xf32>
    %131 = arith.subf %127, %130 : vector<8x16xf32>
    %132 = math.exp %131 : vector<8x16xf32>
    %cst_43 = arith.constant dense<0.000000e+00> : vector<8xf32>
    %133 = vector.multi_reduction <add>, %132, %cst_43 [1] : vector<8x16xf32> to vector<8xf32>
    %134 = vector.shape_cast %133 : vector<8xf32> to vector<8x1xf32>
    %135 = tpu.reciprocal %134 {approx = true} : vector<8x1xf32> -> vector<8x1xf32>
    %136 = vector.broadcast %135 : vector<8x1xf32> to vector<8x16xf32>
    %137 = arith.mulf %132, %136 : vector<8x16xf32>
    %cst_44 = arith.constant dense<0.000000e+00> : vector<8x4xf32>
    %138 = tpu.matmul %137, %126, %cst_44 {dimension_numbers = #tpu.dot_dimension_numbers<[1], [0], [0], [1], [0, 0, 1, 1], [], []>} : vector<8x16xf32>, vector<16x4xf32>, vector<8x4xf32> -> vector<8x4xf32>
    %139 = tpu.concatenate %33, %48, %63, %78, %93, %108, %123, %138 in 1 : vector<8x4xf32>, vector<8x4xf32>, vector<8x4xf32>, vector<8x4xf32>, vector<8x4xf32>, vector<8x4xf32>, vector<8x4xf32>, vector<8x4xf32> -> vector<8x32xf32>
    %c0_45 = arith.constant 0 : index
    %c0_46 = arith.constant 0 : index
    %140 = vector.load %arg7[%c0_45, %c0_46] : memref<32x32xf32, #tpu.memory_space<vmem>>, vector<32x32xf32>
    %cst_47 = arith.constant dense<0.000000e+00> : vector<8x32xf32>
    %141 = tpu.matmul %139, %140, %cst_47 {dimension_numbers = #tpu.dot_dimension_numbers<[1], [0], [0], [1], [0, 0, 1, 1], [], []>} : vector<8x32xf32>, vector<32x32xf32>, vector<8x32xf32> -> vector<8x32xf32>
    %c0_48 = arith.constant 0 : index
    %c0_49 = arith.constant 0 : index
    %142 = vector.load %arg8[%c0_48, %c0_49] : memref<1x32xf32, #tpu.memory_space<vmem>>, vector<1x32xf32>
    %143 = vector.broadcast %142 : vector<1x32xf32> to vector<8x32xf32>
    %144 = arith.addf %141, %143 : vector<8x32xf32>
    %145 = arith.addf %144, %6 : vector<8x32xf32>
    %c0_50 = arith.constant 0 : index
    %c0_51 = arith.constant 0 : index
    %c0_52 = arith.constant 0 : index
    %146 = vector.load %arg9[%c0_50, %c0_51, %c0_52] : memref<1x8x32xf32, #tpu.memory_space<vmem>>, vector<1x8x32xf32>
    %147 = vector.shape_cast %146 : vector<1x8x32xf32> to vector<8x32xf32>
    %148 = vector.shape_cast %145 : vector<8x32xf32> to vector<1x8x32xf32>
    tpu.vector_store %arg9[%c0_50, %c0_51, %c0_52], %148 {strides = array<i32>} : memref<1x8x32xf32, #tpu.memory_space<vmem>>, vector<1x8x32xf32>,
    return
  }
  func.func @transform_0(%arg0: i32, %arg1: i32) -> (i32, i32, i32) {
    %c0_i32 = arith.constant 0 : i32
    %c0_i32_0 = arith.constant 0 : i32
    %c0_i32_1 = arith.constant 0 : i32
    return %arg0, %c0_i32, %c0_i32_0 : i32, i32, i32
  }
  func.func @transform_1(%arg0: i32, %arg1: i32) -> (i32, i32) {
    %c0_i32 = arith.constant 0 : i32
    %c0_i32_0 = arith.constant 0 : i32
    %c0_i32_1 = arith.constant 0 : i32
    return %c0_i32, %c0_i32_0 : i32, i32
  }
  func.func @transform_2(%arg0: i32, %arg1: i32) -> (i32, i32) {
    %c0_i32 = arith.constant 0 : i32
    %c0_i32_0 = arith.constant 0 : i32
    %c0_i32_1 = arith.constant 0 : i32
    return %c0_i32, %c0_i32_0 : i32, i32
  }
  func.func @transform_3(%arg0: i32, %arg1: i32) -> (i32, i32) {
    %c0_i32 = arith.constant 0 : i32
    %c0_i32_0 = arith.constant 0 : i32
    %c0_i32_1 = arith.constant 0 : i32
    return %c0_i32, %c0_i32_0 : i32, i32
  }
  func.func @transform_4(%arg0: i32, %arg1: i32) -> (i32, i32) {
    %c0_i32 = arith.constant 0 : i32
    %c0_i32_0 = arith.constant 0 : i32
    %c0_i32_1 = arith.constant 0 : i32
    return %c0_i32, %c0_i32_0 : i32, i32
  }
  func.func @transform_5(%arg0: i32, %arg1: i32) -> (i32, i32) {
    %c0_i32 = arith.constant 0 : i32
    %c0_i32_0 = arith.constant 0 : i32
    %c0_i32_1 = arith.constant 0 : i32
    return %c0_i32, %c0_i32_0 : i32, i32
  }
  func.func @transform_6(%arg0: i32, %arg1: i32) -> (i32, i32) {
    %c0_i32 = arith.constant 0 : i32
    %c0_i32_0 = arith.constant 0 : i32
    %c0_i32_1 = arith.constant 0 : i32
    return %c0_i32, %c0_i32_0 : i32, i32
  }
  func.func @transform_7(%arg0: i32, %arg1: i32) -> (i32, i32, i32) {
    %c0_i32 = arith.constant 0 : i32
    %c0_i32_0 = arith.constant 0 : i32
    return %arg0, %arg1, %c0_i32 : i32, i32, i32
  }
}

module attributes {stable_mosaic.version = 11 : i64} {
  func.func @_residual_attention_kernel(%arg0: i32, %arg1: i32, %arg2: memref<1x16x32xf32, #tpu.memory_space<vmem>>, %arg3: memref<32x32xf32, #tpu.memory_space<vmem>>, %arg4: memref<32x64xf32, #tpu.memory_space<vmem>>, %arg5: memref<1x32xf32, #tpu.memory_space<vmem>>, %arg6: memref<1x64xf32, #tpu.memory_space<vmem>>, %arg7: memref<32x32xf32, #tpu.memory_space<vmem>>, %arg8: memref<1x32xf32, #tpu.memory_space<vmem>>, %arg9: memref<1x8x32xf32, #tpu.memory_space<vmem>>) attributes {dimension_semantics = [#tpu.dimension_semantics<parallel>, #tpu.dimension_semantics<parallel>], iteration_bounds = array<i64: 2, 2>, scalar_prefetch = 0 : i64, scratch_operands = 0 : i64, tpu.core_type = #tpu.core_type<tc>, window_params = [{transform_indices = @transform_0, window_bounds = array<i64: 1, 16, 32>}, {pipeline_mode = #tpu.pipeline_mode<synchronous>, transform_indices = @transform_1, window_bounds = array<i64: 32, 32>}, {pipeline_mode = #tpu.pipeline_mode<synchronous>, transform_indices = @transform_2, window_bounds = array<i64: 32, 64>}, {pipeline_mode = #tpu.pipeline_mode<synchronous>, transform_indices = @transform_3, window_bounds = array<i64: 1, 32>}, {pipeline_mode = #tpu.pipeline_mode<synchronous>, transform_indices = @transform_4, window_bounds = array<i64: 1, 64>}, {pipeline_mode = #tpu.pipeline_mode<synchronous>, transform_indices = @transform_5, window_bounds = array<i64: 32, 32>}, {pipeline_mode = #tpu.pipeline_mode<synchronous>, transform_indices = @transform_6, window_bounds = array<i64: 1, 32>}, {transform_indices = @transform_7, window_bounds = array<i64: 1, 8, 32>}]} {
    %c8_i32 = arith.constant 8 : i32
    %0 = arith.muli %arg1, %c8_i32 : i32
    %1 = tpu.assume_multiple %0, 8 : i32
    %c0 = arith.constant 0 : index
    %c0_0 = arith.constant 0 : index
    %c0_1 = arith.constant 0 : index
    %2 = vector.load %arg2[%c0, %c0_0, %c0_1] : memref<1x16x32xf32, #tpu.memory_space<vmem>>, vector<1x16x32xf32>
    %3 = vector.shape_cast %2 : vector<1x16x32xf32> to vector<16x32xf32>
    %c0_2 = arith.constant 0 : index
    %4 = arith.index_cast %1 : i32 to index
    %c0_3 = arith.constant 0 : index
    %5 = vector.load %arg2[%c0_2, %4, %c0_3] : memref<1x16x32xf32, #tpu.memory_space<vmem>>, vector<1x8x32xf32>
    %6 = vector.shape_cast %5 : vector<1x8x32xf32> to vector<8x32xf32>
    %c0_4 = arith.constant 0 : index
    %c0_5 = arith.constant 0 : index
    %7 = vector.load %arg3[%c0_4, %c0_5] : memref<32x32xf32, #tpu.memory_space<vmem>>, vector<32x32xf32>
    %cst = arith.constant dense<0.000000e+00> : vector<8x32xf32>
    %8 = tpu.matmul %6, %7, %cst {dimension_numbers = #tpu.dot_dimension_numbers<[1], [0], [0], [1], [0, 0, 1, 1], [], []>} : vector<8x32xf32>, vector<32x32xf32>, vector<8x32xf32> -> vector<8x32xf32>
    %c0_6 = arith.constant 0 : index
    %c0_7 = arith.constant 0 : index
    %9 = vector.load %arg5[%c0_6, %c0_7] : memref<1x32xf32, #tpu.memory_space<vmem>>, vector<1x32xf32>
    %10 = vector.broadcast %9 : vector<1x32xf32> to vector<8x32xf32>
    %11 = arith.addf %8, %10 : vector<8x32xf32>
    %c0_8 = arith.constant 0 : index
    %c0_9 = arith.constant 0 : index
    %12 = vector.load %arg4[%c0_8, %c0_9] : memref<32x64xf32, #tpu.memory_space<vmem>>, vector<32x64xf32>
    %cst_10 = arith.constant dense<0.000000e+00> : vector<16x64xf32>
    %13 = tpu.matmul %3, %12, %cst_10 {dimension_numbers = #tpu.dot_dimension_numbers<[1], [0], [0], [1], [0, 0, 1, 1], [], []>} : vector<16x32xf32>, vector<32x64xf32>, vector<16x64xf32> -> vector<16x64xf32>
    %c0_11 = arith.constant 0 : index
    %c0_12 = arith.constant 0 : index
    %14 = vector.load %arg6[%c0_11, %c0_12] : memref<1x64xf32, #tpu.memory_space<vmem>>, vector<1x64xf32>
    %15 = vector.broadcast %14 : vector<1x64xf32> to vector<16x64xf32>
    %16 = arith.addf %13, %15 : vector<16x64xf32>
    %17 = vector.extract_strided_slice %16 {offsets = [0, 0], sizes = [16, 32], strides = [1, 1]} : vector<16x64xf32> to vector<16x32xf32>
    %18 = vector.extract_strided_slice %16 {offsets = [0, 32], sizes = [16, 32], strides = [1, 1]} : vector<16x64xf32> to vector<16x32xf32>
    %19 = vector.extract_strided_slice %11 {offsets = [0, 0], sizes = [8, 4], strides = [1, 1]} : vector<8x32xf32> to vector<8x4xf32>
    %20 = vector.extract_strided_slice %17 {offsets = [0, 0], sizes = [16, 4], strides = [1, 1]} : vector<16x32xf32> to vector<16x4xf32>
    %21 = vector.extract_strided_slice %18 {offsets = [0, 0], sizes = [16, 4], strides = [1, 1]} : vector<16x32xf32> to vector<16x4xf32>
    "tpu.trace_start"() <{level = 10 : i32, message = "qd,kd->qk"}> : () -> ()
    %cst_13 = arith.constant dense<0.000000e+00> : vector<8x16xf32>
    %22 = tpu.matmul %19, %20, %cst_13 {dimension_numbers = #tpu.dot_dimension_numbers<[1], [1], [0], [0], [0, 0, 1, 0], [], []>} : vector<8x4xf32>, vector<16x4xf32>, vector<8x16xf32> -> vector<8x16xf32>
    "tpu.trace_stop"() : () -> ()
    %cst_14 = arith.constant dense<0xFF800000> : vector<8xf32>
    %23 = vector.multi_reduction <maximumf>, %22, %cst_14 [1] : vector<8x16xf32> to vector<8xf32>
    %24 = vector.shape_cast %23 : vector<8xf32> to vector<8x1xf32>
    %25 = vector.broadcast %24 : vector<8x1xf32> to vector<8x16xf32>
    %26 = arith.subf %22, %25 : vector<8x16xf32>
    %27 = math.exp %26 : vector<8x16xf32>
    %cst_15 = arith.constant dense<0.000000e+00> : vector<8xf32>
    %28 = vector.multi_reduction <add>, %27, %cst_15 [1] : vector<8x16xf32> to vector<8xf32>
    %29 = vector.shape_cast %28 : vector<8xf32> to vector<8x1xf32>
    %30 = tpu.reciprocal %29 {approx = true} : vector<8x1xf32> -> vector<8x1xf32>
    %31 = vector.broadcast %30 : vector<8x1xf32> to vector<8x16xf32>
    %32 = arith.mulf %27, %31 : vector<8x16xf32>
    %cst_16 = arith.constant dense<0.000000e+00> : vector<8x4xf32>
    %33 = tpu.matmul %32, %21, %cst_16 {dimension_numbers = #tpu.dot_dimension_numbers<[1], [0], [0], [1], [0, 0, 1, 1], [], []>} : vector<8x16xf32>, vector<16x4xf32>, vector<8x4xf32> -> vector<8x4xf32>
    %34 = vector.extract_strided_slice %11 {offsets = [0, 4], sizes = [8, 4], strides = [1, 1]} : vector<8x32xf32> to vector<8x4xf32>
    %35 = vector.extract_strided_slice %17 {offsets = [0, 4], sizes = [16, 4], strides = [1, 1]} : vector<16x32xf32> to vector<16x4xf32>
    %36 = vector.extract_strided_slice %18 {offsets = [0, 4], sizes = [16, 4], strides = [1, 1]} : vector<16x32xf32> to vector<16x4xf32>
    "tpu.trace_start"() <{level = 10 : i32, message = "qd,kd->qk"}> : () -> ()
    %cst_17 = arith.constant dense<0.000000e+00> : vector<8x16xf32>
    %37 = tpu.matmul %34, %35, %cst_17 {dimension_numbers = #tpu.dot_dimension_numbers<[1], [1], [0], [0], [0, 0, 1, 0], [], []>} : vector<8x4xf32>, vector<16x4xf32>, vector<8x16xf32> -> vector<8x16xf32>
    "tpu.trace_stop"() : () -> ()
    %cst_18 = arith.constant dense<0xFF800000> : vector<8xf32>
    %38 = vector.multi_reduction <maximumf>, %37, %cst_18 [1] : vector<8x16xf32> to vector<8xf32>
    %39 = vector.shape_cast %38 : vector<8xf32> to vector<8x1xf32>
    %40 = vector.broadcast %39 : vector<8x1xf32> to vector<8x16xf32>
    %41 = arith.subf %37, %40 : vector<8x16xf32>
    %42 = math.exp %41 : vector<8x16xf32>
    %cst_19 = arith.constant dense<0.000000e+00> : vector<8xf32>
    %43 = vector.multi_reduction <add>, %42, %cst_19 [1] : vector<8x16xf32> to vector<8xf32>
    %44 = vector.shape_cast %43 : vector<8xf32> to vector<8x1xf32>
    %45 = tpu.reciprocal %44 {approx = true} : vector<8x1xf32> -> vector<8x1xf32>
    %46 = vector.broadcast %45 : vector<8x1xf32> to vector<8x16xf32>
    %47 = arith.mulf %42, %46 : vector<8x16xf32>
    %cst_20 = arith.constant dense<0.000000e+00> : vector<8x4xf32>
    %48 = tpu.matmul %47, %36, %cst_20 {dimension_numbers = #tpu.dot_dimension_numbers<[1], [0], [0], [1], [0, 0, 1, 1], [], []>} : vector<8x16xf32>, vector<16x4xf32>, vector<8x4xf32> -> vector<8x4xf32>
    %49 = vector.extract_strided_slice %11 {offsets = [0, 8], sizes = [8, 4], strides = [1, 1]} : vector<8x32xf32> to vector<8x4xf32>
    %50 = vector.extract_strided_slice %17 {offsets = [0, 8], sizes = [16, 4], strides = [1, 1]} : vector<16x32xf32> to vector<16x4xf32>
    %51 = vector.extract_strided_slice %18 {offsets = [0, 8], sizes = [16, 4], strides = [1, 1]} : vector<16x32xf32> to vector<16x4xf32>
    "tpu.trace_start"() <{level = 10 : i32, message = "qd,kd->qk"}> : () -> ()
    %cst_21 = arith.constant dense<0.000000e+00> : vector<8x16xf32>
    %52 = tpu.matmul %49, %50, %cst_21 {dimension_numbers = #tpu.dot_dimension_numbers<[1], [1], [0], [0], [0, 0, 1, 0], [], []>} : vector<8x4xf32>, vector<16x4xf32>, vector<8x16xf32> -> vector<8x16xf32>
    "tpu.trace_stop"() : () -> ()
    %cst_22 = arith.constant dense<0xFF800000> : vector<8xf32>
    %53 = vector.multi_reduction <maximumf>, %52, %cst_22 [1] : vector<8x16xf32> to vector<8xf32>
    %54 = vector.shape_cast %53 : vector<8xf32> to vector<8x1xf32>
    %55 = vector.broadcast %54 : vector<8x1xf32> to vector<8x16xf32>
    %56 = arith.subf %52, %55 : vector<8x16xf32>
    %57 = math.exp %56 : vector<8x16xf32>
    %cst_23 = arith.constant dense<0.000000e+00> : vector<8xf32>
    %58 = vector.multi_reduction <add>, %57, %cst_23 [1] : vector<8x16xf32> to vector<8xf32>
    %59 = vector.shape_cast %58 : vector<8xf32> to vector<8x1xf32>
    %60 = tpu.reciprocal %59 {approx = true} : vector<8x1xf32> -> vector<8x1xf32>
    %61 = vector.broadcast %60 : vector<8x1xf32> to vector<8x16xf32>
    %62 = arith.mulf %57, %61 : vector<8x16xf32>
    %cst_24 = arith.constant dense<0.000000e+00> : vector<8x4xf32>
    %63 = tpu.matmul %62, %51, %cst_24 {dimension_numbers = #tpu.dot_dimension_numbers<[1], [0], [0], [1], [0, 0, 1, 1], [], []>} : vector<8x16xf32>, vector<16x4xf32>, vector<8x4xf32> -> vector<8x4xf32>
    %64 = vector.extract_strided_slice %11 {offsets = [0, 12], sizes = [8, 4], strides = [1, 1]} : vector<8x32xf32> to vector<8x4xf32>
    %65 = vector.extract_strided_slice %17 {offsets = [0, 12], sizes = [16, 4], strides = [1, 1]} : vector<16x32xf32> to vector<16x4xf32>
    %66 = vector.extract_strided_slice %18 {offsets = [0, 12], sizes = [16, 4], strides = [1, 1]} : vector<16x32xf32> to vector<16x4xf32>
    "tpu.trace_start"() <{level = 10 : i32, message = "qd,kd->qk"}> : () -> ()
    %cst_25 = arith.constant dense<0.000000e+00> : vector<8x16xf32>
    %67 = tpu.matmul %64, %65, %cst_25 {dimension_numbers = #tpu.dot_dimension_numbers<[1], [1], [0], [0], [0, 0, 1, 0], [], []>} : vector<8x4xf32>, vector<16x4xf32>, vector<8x16xf32> -> vector<8x16xf32>
    "tpu.trace_stop"() : () -> ()
    %cst_26 = arith.constant dense<0xFF800000> : vector<8xf32>
    %68 = vector.multi_reduction <maximumf>, %67, %cst_26 [1] : vector<8x16xf32> to vector<8xf32>
    %69 = vector.shape_cast %68 : vector<8xf32> to vector<8x1xf32>
    %70 = vector.broadcast %69 : vector<8x1xf32> to vector<8x16xf32>
    %71 = arith.subf %67, %70 : vector<8x16xf32>
    %72 = math.exp %71 : vector<8x16xf32>
    %cst_27 = arith.constant dense<0.000000e+00> : vector<8xf32>
    %73 = vector.multi_reduction <add>, %72, %cst_27 [1] : vector<8x16xf32> to vector<8xf32>
    %74 = vector.shape_cast %73 : vector<8xf32> to vector<8x1xf32>
    %75 = tpu.reciprocal %74 {approx = true} : vector<8x1xf32> -> vector<8x1xf32>
    %76 = vector.broadcast %75 : vector<8x1xf32> to vector<8x16xf32>
    %77 = arith.mulf %72, %76 : vector<8x16xf32>
    %cst_28 = arith.constant dense<0.000000e+00> : vector<8x4xf32>
    %78 = tpu.matmul %77, %66, %cst_28 {dimension_numbers = #tpu.dot_dimension_numbers<[1], [0], [0], [1], [0, 0, 1, 1], [], []>} : vector<8x16xf32>, vector<16x4xf32>, vector<8x4xf32> -> vector<8x4xf32>
    %79 = vector.extract_strided_slice %11 {offsets = [0, 16], sizes = [8, 4], strides = [1, 1]} : vector<8x32xf32> to vector<8x4xf32>
    %80 = vector.extract_strided_slice %17 {offsets = [0, 16], sizes = [16, 4], strides = [1, 1]} : vector<16x32xf32> to vector<16x4xf32>
    %81 = vector.extract_strided_slice %18 {offsets = [0, 16], sizes = [16, 4], strides = [1, 1]} : vector<16x32xf32> to vector<16x4xf32>
    "tpu.trace_start"() <{level = 10 : i32, message = "qd,kd->qk"}> : () -> ()
    %cst_29 = arith.constant dense<0.000000e+00> : vector<8x16xf32>
    %82 = tpu.matmul %79, %80, %cst_29 {dimension_numbers = #tpu.dot_dimension_numbers<[1], [1], [0], [0], [0, 0, 1, 0], [], []>} : vector<8x4xf32>, vector<16x4xf32>, vector<8x16xf32> -> vector<8x16xf32>
    "tpu.trace_stop"() : () -> ()
    %cst_30 = arith.constant dense<0xFF800000> : vector<8xf32>
    %83 = vector.multi_reduction <maximumf>, %82, %cst_30 [1] : vector<8x16xf32> to vector<8xf32>
    %84 = vector.shape_cast %83 : vector<8xf32> to vector<8x1xf32>
    %85 = vector.broadcast %84 : vector<8x1xf32> to vector<8x16xf32>
    %86 = arith.subf %82, %85 : vector<8x16xf32>
    %87 = math.exp %86 : vector<8x16xf32>
    %cst_31 = arith.constant dense<0.000000e+00> : vector<8xf32>
    %88 = vector.multi_reduction <add>, %87, %cst_31 [1] : vector<8x16xf32> to vector<8xf32>
    %89 = vector.shape_cast %88 : vector<8xf32> to vector<8x1xf32>
    %90 = tpu.reciprocal %89 {approx = true} : vector<8x1xf32> -> vector<8x1xf32>
    %91 = vector.broadcast %90 : vector<8x1xf32> to vector<8x16xf32>
    %92 = arith.mulf %87, %91 : vector<8x16xf32>
    %cst_32 = arith.constant dense<0.000000e+00> : vector<8x4xf32>
    %93 = tpu.matmul %92, %81, %cst_32 {dimension_numbers = #tpu.dot_dimension_numbers<[1], [0], [0], [1], [0, 0, 1, 1], [], []>} : vector<8x16xf32>, vector<16x4xf32>, vector<8x4xf32> -> vector<8x4xf32>
    %94 = vector.extract_strided_slice %11 {offsets = [0, 20], sizes = [8, 4], strides = [1, 1]} : vector<8x32xf32> to vector<8x4xf32>
    %95 = vector.extract_strided_slice %17 {offsets = [0, 20], sizes = [16, 4], strides = [1, 1]} : vector<16x32xf32> to vector<16x4xf32>
    %96 = vector.extract_strided_slice %18 {offsets = [0, 20], sizes = [16, 4], strides = [1, 1]} : vector<16x32xf32> to vector<16x4xf32>
    "tpu.trace_start"() <{level = 10 : i32, message = "qd,kd->qk"}> : () -> ()
    %cst_33 = arith.constant dense<0.000000e+00> : vector<8x16xf32>
    %97 = tpu.matmul %94, %95, %cst_33 {dimension_numbers = #tpu.dot_dimension_numbers<[1], [1], [0], [0], [0, 0, 1, 0], [], []>} : vector<8x4xf32>, vector<16x4xf32>, vector<8x16xf32> -> vector<8x16xf32>
    "tpu.trace_stop"() : () -> ()
    %cst_34 = arith.constant dense<0xFF800000> : vector<8xf32>
    %98 = vector.multi_reduction <maximumf>, %97, %cst_34 [1] : vector<8x16xf32> to vector<8xf32>
    %99 = vector.shape_cast %98 : vector<8xf32> to vector<8x1xf32>
    %100 = vector.broadcast %99 : vector<8x1xf32> to vector<8x16xf32>
    %101 = arith.subf %97, %100 : vector<8x16xf32>
    %102 = math.exp %101 : vector<8x16xf32>
    %cst_35 = arith.constant dense<0.000000e+00> : vector<8xf32>
    %103 = vector.multi_reduction <add>, %102, %cst_35 [1] : vector<8x16xf32> to vector<8xf32>
    %104 = vector.shape_cast %103 : vector<8xf32> to vector<8x1xf32>
    %105 = tpu.reciprocal %104 {approx = true} : vector<8x1xf32> -> vector<8x1xf32>
    %106 = vector.broadcast %105 : vector<8x1xf32> to vector<8x16xf32>
    %107 = arith.mulf %102, %106 : vector<8x16xf32>
    %cst_36 = arith.constant dense<0.000000e+00> : vector<8x4xf32>
    %108 = tpu.matmul %107, %96, %cst_36 {dimension_numbers = #tpu.dot_dimension_numbers<[1], [0], [0], [1], [0, 0, 1, 1], [], []>} : vector<8x16xf32>, vector<16x4xf32>, vector<8x4xf32> -> vector<8x4xf32>
    %109 = vector.extract_strided_slice %11 {offsets = [0, 24], sizes = [8, 4], strides = [1, 1]} : vector<8x32xf32> to vector<8x4xf32>
    %110 = vector.extract_strided_slice %17 {offsets = [0, 24], sizes = [16, 4], strides = [1, 1]} : vector<16x32xf32> to vector<16x4xf32>
    %111 = vector.extract_strided_slice %18 {offsets = [0, 24], sizes = [16, 4], strides = [1, 1]} : vector<16x32xf32> to vector<16x4xf32>
    "tpu.trace_start"() <{level = 10 : i32, message = "qd,kd->qk"}> : () -> ()
    %cst_37 = arith.constant dense<0.000000e+00> : vector<8x16xf32>
    %112 = tpu.matmul %109, %110, %cst_37 {dimension_numbers = #tpu.dot_dimension_numbers<[1], [1], [0], [0], [0, 0, 1, 0], [], []>} : vector<8x4xf32>, vector<16x4xf32>, vector<8x16xf32> -> vector<8x16xf32>
    "tpu.trace_stop"() : () -> ()
    %cst_38 = arith.constant dense<0xFF800000> : vector<8xf32>
    %113 = vector.multi_reduction <maximumf>, %112, %cst_38 [1] : vector<8x16xf32> to vector<8xf32>
    %114 = vector.shape_cast %113 : vector<8xf32> to vector<8x1xf32>
    %115 = vector.broadcast %114 : vector<8x1xf32> to vector<8x16xf32>
    %116 = arith.subf %112, %115 : vector<8x16xf32>
    %117 = math.exp %116 : vector<8x16xf32>
    %cst_39 = arith.constant dense<0.000000e+00> : vector<8xf32>
    %118 = vector.multi_reduction <add>, %117, %cst_39 [1] : vector<8x16xf32> to vector<8xf32>
    %119 = vector.shape_cast %118 : vector<8xf32> to vector<8x1xf32>
    %120 = tpu.reciprocal %119 {approx = true} : vector<8x1xf32> -> vector<8x1xf32>
    %121 = vector.broadcast %120 : vector<8x1xf32> to vector<8x16xf32>
    %122 = arith.mulf %117, %121 : vector<8x16xf32>
    %cst_40 = arith.constant dense<0.000000e+00> : vector<8x4xf32>
    %123 = tpu.matmul %122, %111, %cst_40 {dimension_numbers = #tpu.dot_dimension_numbers<[1], [0], [0], [1], [0, 0, 1, 1], [], []>} : vector<8x16xf32>, vector<16x4xf32>, vector<8x4xf32> -> vector<8x4xf32>
    %124 = vector.extract_strided_slice %11 {offsets = [0, 28], sizes = [8, 4], strides = [1, 1]} : vector<8x32xf32> to vector<8x4xf32>
    %125 = vector.extract_strided_slice %17 {offsets = [0, 28], sizes = [16, 4], strides = [1, 1]} : vector<16x32xf32> to vector<16x4xf32>
    %126 = vector.extract_strided_slice %18 {offsets = [0, 28], sizes = [16, 4], strides = [1, 1]} : vector<16x32xf32> to vector<16x4xf32>
    "tpu.trace_start"() <{level = 10 : i32, message = "qd,kd->qk"}> : () -> ()
    %cst_41 = arith.constant dense<0.000000e+00> : vector<8x16xf32>
    %127 = tpu.matmul %124, %125, %cst_41 {dimension_numbers = #tpu.dot_dimension_numbers<[1], [1], [0], [0], [0, 0, 1, 0], [], []>} : vector<8x4xf32>, vector<16x4xf32>, vector<8x16xf32> -> vector<8x16xf32>
    "tpu.trace_stop"() : () -> ()
    %cst_42 = arith.constant dense<0xFF800000> : vector<8xf32>
    %128 = vector.multi_reduction <maximumf>, %127, %cst_42 [1] : vector<8x16xf32> to vector<8xf32>
    %129 = vector.shape_cast %128 : vector<8xf32> to vector<8x1xf32>
    %130 = vector.broadcast %129 : vector<8x1xf32> to vector<8x16xf32>
    %131 = arith.subf %127, %130 : vector<8x16xf32>
    %132 = math.exp %131 : vector<8x16xf32>
    %cst_43 = arith.constant dense<0.000000e+00> : vector<8xf32>
    %133 = vector.multi_reduction <add>, %132, %cst_43 [1] : vector<8x16xf32> to vector<8xf32>
    %134 = vector.shape_cast %133 : vector<8xf32> to vector<8x1xf32>
    %135 = tpu.reciprocal %134 {approx = true} : vector<8x1xf32> -> vector<8x1xf32>
    %136 = vector.broadcast %135 : vector<8x1xf32> to vector<8x16xf32>
    %137 = arith.mulf %132, %136 : vector<8x16xf32>
    %cst_44 = arith.constant dense<0.000000e+00> : vector<8x4xf32>
    %138 = tpu.matmul %137, %126, %cst_44 {dimension_numbers = #tpu.dot_dimension_numbers<[1], [0], [0], [1], [0, 0, 1, 1], [], []>} : vector<8x16xf32>, vector<16x4xf32>, vector<8x4xf32> -> vector<8x4xf32>
    %139 = tpu.concatenate %33, %48, %63, %78, %93, %108, %123, %138 in 1 : vector<8x4xf32>, vector<8x4xf32>, vector<8x4xf32>, vector<8x4xf32>, vector<8x4xf32>, vector<8x4xf32>, vector<8x4xf32>, vector<8x4xf32> -> vector<8x32xf32>
    %c0_45 = arith.constant 0 : index
    %c0_46 = arith.constant 0 : index
    %140 = vector.load %arg7[%c0_45, %c0_46] : memref<32x32xf32, #tpu.memory_space<vmem>>, vector<32x32xf32>
    %cst_47 = arith.constant dense<0.000000e+00> : vector<8x32xf32>
    %141 = tpu.matmul %139, %140, %cst_47 {dimension_numbers = #tpu.dot_dimension_numbers<[1], [0], [0], [1], [0, 0, 1, 1], [], []>} : vector<8x32xf32>, vector<32x32xf32>, vector<8x32xf32> -> vector<8x32xf32>
    %c0_48 = arith.constant 0 : index
    %c0_49 = arith.constant 0 : index
    %142 = vector.load %arg8[%c0_48, %c0_49] : memref<1x32xf32, #tpu.memory_space<vmem>>, vector<1x32xf32>
    %143 = vector.broadcast %142 : vector<1x32xf32> to vector<8x32xf32>
    %144 = arith.addf %141, %143 : vector<8x32xf32>
    %145 = arith.addf %144, %6 : vector<8x32xf32>
    %c0_50 = arith.constant 0 : index
    %c0_51 = arith.constant 0 : index
    %c0_52 = arith.constant 0 : index
    %146 = vector.load %arg9[%c0_50, %c0_51, %c0_52] : memref<1x8x32xf32, #tpu.memory_space<vmem>>, vector<1x8x32xf32>
    %147 = vector.shape_cast %146 : vector<1x8x32xf32> to vector<8x32xf32>
    %148 = vector.shape_cast %145 : vector<8x32xf32> to vector<1x8x32xf32>
    tpu.vector_store %arg9[%c0_50, %c0_51, %c0_52], %148 {strides = array<i32>} : memref<1x8x32xf32, #tpu.memory_space<vmem>>, vector<1x8x32xf32>,
    return
  }
  func.func @transform_0(%arg0: i32, %arg1: i32) -> (i32, i32, i32) {
    %c0_i32 = arith.constant 0 : i32
    %c0_i32_0 = arith.constant 0 : i32
    %c0_i32_1 = arith.constant 0 : i32
    return %arg0, %c0_i32, %c0_i32_0 : i32, i32, i32
  }
  func.func @transform_1(%arg0: i32, %arg1: i32) -> (i32, i32) {
    %c0_i32 = arith.constant 0 : i32
    %c0_i32_0 = arith.constant 0 : i32
    %c0_i32_1 = arith.constant 0 : i32
    return %c0_i32, %c0_i32_0 : i32, i32
  }
  func.func @transform_2(%arg0: i32, %arg1: i32) -> (i32, i32) {
    %c0_i32 = arith.constant 0 : i32
    %c0_i32_0 = arith.constant 0 : i32
    %c0_i32_1 = arith.constant 0 : i32
    return %c0_i32, %c0_i32_0 : i32, i32
  }
  func.func @transform_3(%arg0: i32, %arg1: i32) -> (i32, i32) {
    %c0_i32 = arith.constant 0 : i32
    %c0_i32_0 = arith.constant 0 : i32
    %c0_i32_1 = arith.constant 0 : i32
    return %c0_i32, %c0_i32_0 : i32, i32
  }
  func.func @transform_4(%arg0: i32, %arg1: i32) -> (i32, i32) {
    %c0_i32 = arith.constant 0 : i32
    %c0_i32_0 = arith.constant 0 : i32
    %c0_i32_1 = arith.constant 0 : i32
    return %c0_i32, %c0_i32_0 : i32, i32
  }
  func.func @transform_5(%arg0: i32, %arg1: i32) -> (i32, i32) {
    %c0_i32 = arith.constant 0 : i32
    %c0_i32_0 = arith.constant 0 : i32
    %c0_i32_1 = arith.constant 0 : i32
    return %c0_i32, %c0_i32_0 : i32, i32
  }
  func.func @transform_6(%arg0: i32, %arg1: i32) -> (i32, i32) {
    %c0_i32 = arith.constant 0 : i32
    %c0_i32_0 = arith.constant 0 : i32
    %c0_i32_1 = arith.constant 0 : i32
    return %c0_i32, %c0_i32_0 : i32, i32
  }
  func.func @transform_7(%arg0: i32, %arg1: i32) -> (i32, i32, i32) {
    %c0_i32 = arith.constant 0 : i32
    %c0_i32_0 = arith.constant 0 : i32
    return %arg0, %arg1, %c0_i32 : i32, i32, i32
  }
}

</mosaic_0001>

<bundles_post_ra>
// kernel: tpu_custom_call.1
= control target key start
LH: loop header
LB: loop body
LE: loop exit
PB: predicated region body
PF: predicated region fallthrough
CT: control target
= control target key end

     0   :  { %s3621_s0 = inlined_call_operand.hbm [shape: f32[2,16,32], index: 0, kind: input, shape index: {}]   ;;  %s3622_s1 = inlined_call_operand.hbm [shape: f32[32,32], index: 1, kind: input, shape index: {}]   ;;  %s3623_s2 = inlined_call_operand.hbm [shape: f32[32,64], index: 2, kind: input, shape index: {}]   ;;  %s3624_s3 = inlined_call_operand.vmem [shape: f32[1,32], index: 3, kind: input, shape index: {}]   ;;  %s3625_s4 = inlined_call_operand.vmem [shape: f32[1,64], index: 4, kind: input, shape index: {}]   ;;  %s3626_s5 = inlined_call_operand.hbm [shape: f32[32,32], index: 5, kind: input, shape index: {}]   ;;  %s3627_s6 = inlined_call_operand.vmem [shape: f32[1,32], index: 6, kind: input, shape index: {}]   ;;  %s3628_s7 = inlined_call_operand.hbm [shape: f32[2,16,32], index: 7, kind: output, shape index: {}]  }
   0x1   :  { %3642 = sst [smem:[#allocation20_spill]] %s3622_s1 }
   0x2   :  { %3643 = sst [smem:[#allocation21_spill]] %s3623_s2 }
   0x3   :  { %3644 = sst [smem:[#allocation22_spill]] %s3624_s3 }
   0x4   :  { %3645 = sst [smem:[#allocation23_spill]] %s3627_s6 }
   0x5   :  { %3646 = sst [smem:[#allocation24_spill]] %s3628_s7 }
   0x6   :  { %12 = vsyncpa [#allocation3], 0 }
   0x7   :  { %14 = vsyncpa [#allocation3 + $0x1], 0 }
   0x8   :  { %15 = vsyncpa [#allocation6], 0 }
   0x9   :  { %16 = vsyncpa [#allocation9], 0 }
   0xa   :  { %17 = vsyncpa [#allocation4], 0 }
   0xb   :  { %19 = vsyncpa [#allocation4 + $0x1], 0  ;;  %s3100_s24 = smov 0   ;;  %s3102_s25 = smov 0  }
   0xc   :  { %s3104_s26 = smov 0   ;;  %s3106_s27 = smov 0  }
   0xd   :  { %s3108_s28 = smov 0   ;;  %s3110_s29 = smov 0  }
   0xe   :  { %s3112_s30 = smov 0   ;;  %s3114_s8 = smov 0  }
   0xf   :  { %s3116_s9 = smov 0   ;;  %s3118_s10 = smov 0  }
  0x10   :  { %s3120_s11 = smov 0  }
  0x11 LB: > { %3647 = sst [smem:[#allocation15_spill]] %s2986_s24  ;;  %s2168_s12 = sadd.s32 4294967295, %s3026_s11   ;;  %s3026_s11 = sphi %s3120_s11, %s25_s11   ;;  %s3022_s10 = sphi %s3118_s10, %s3690_s10   ;;  %s3018_s9 = sphi %s3116_s9, %s3689_s9   ;;  %s3014_s8 = sphi %s3114_s8, %s3688_s8   ;;  %s3010_s30 = sphi %s3112_s30, %s3687_s30   ;;  %s3006_s29 = sphi %s3110_s29, %s3686_s29   ;;  %s3002_s28 = sphi %s3108_s28, %s3685_s28   ;;  %s2998_s27 = sphi %s3106_s27, %s3684_s27   ;;  %s2994_s26 = sphi %s3104_s26, %s3683_s26   ;;  %s2990_s25 = sphi %s3102_s25, %s3682_s25   ;;  %s2986_s24 = sphi %s3100_s24, %s3681_s24  }
  0x12   : > { %3648 = sst [smem:[#allocation16_spill]] %s2990_s25  ;;  %s2169_s13 = sadd.s32 4294967294, %s3026_s11  }
  0x13   : > { %3649 = sst [smem:[#allocation17_spill]] %s3014_s8  ;;  %p57_p0 = scmp.ne.s32.totalorder %s3002_s28, %s2998_s27 }
  0x14   : > { %p3156_p1 = scmp.eq.s32.totalorder %s2168_s12, 0  ;;  %p208_p2 = scmp.ne.s32.totalorder %s2994_s26, %s2990_s25 }
  0x15   : > { %p209_p4 = scmp.eq.s32.totalorder %s2168_s12, 3  ;;  %p214_p5 = scmp.ne.s32.totalorder %s2990_s25, %s2986_s24 }
  0x16   : > { %s3650_s14 = scalar_select %p3156_p1, 1, 0 }
  0x17   : > { %p3165_p3 = por %p3156_p1, %p57_p0  ;;  %p215_p6 = scmp.eq.s32.totalorder %s2169_s13, 3 }
  0x18   : > { %p3171_p7 = por %p209_p4, %p208_p2  ;;  %p2170_p8 = scmp.ge.s32.totalorder %s3026_s11, 1 }
  0x19   : > { %s3651_s16 = scalar_select %p3165_p3, 1, 0 }
  0x1a   : > { %s3652_s17 = scalar_select %p3171_p7, 1, 0 }
  0x1b   : > { %p3176_p9 = por %p215_p6, %p214_p5  ;;  %p222_p10 = scmp.lt.s32.totalorder %s3026_s11, 5 }
  0x1c   : > { %3653 = sst [smem:[#allocation18_spill]] %s3652_s17  ;;  %s3028_s20 = smov [#allocation5]  }
  0x1d   : > { %s3654_s18 = scalar_select %p3176_p9, 1, 0 }
  0x1e   : > { %p3181_p11 = pnand %p2170_p8, %p222_p10  ;;  %s234_s21 = sshll.u32 %s3028_s20, 4  ;;  %s3185_s21 = int_to_ptr.vmem [resolvable:$true] %s234_s21 }
  0x1f   : > { %3655 = sst [smem:[#allocation19_spill]] %s3654_s18  ;;  %s3029_s23 = smov [#allocation7]  }
  0x20   : > { %s3656_s19 = scalar_select %p3181_p11, 1, 0 }
  0x21   : > { %p2531_p12 = pneg %p3181_p11  ;;  %s247_s27 = sshll.u32 %s3029_s23, 4  ;;  %s3195_s27 = int_to_ptr.vmem [resolvable:$true] %s247_s27 }
  0x22   : > { %s3030_s12 = smov [#allocation8]   ;;  %s3658_s1 = sld [smem:[#allocation20_spill]] }
  0x23   : > { %p3191_p13 = pnand %p2531_p12, %p3156_p1  ;;  %s3197_s13 = sshll.u32 %s3030_s12, 4  ;;  %s267_s13 = int_to_ptr.vmem [resolvable:$true] %s3197_s13 }
  0x25   : > { %p3207_p2 = pneg %p3191_p13 }
  0x28   : > { %s2782_s20 = scalar_lea.hbm %s3658_s1, 512 }
  0x29   : > { %p2783_p0 = scmp.ne.s32.totalorder %s3658_s1, %s2782_s20  ;;  %p2789_p6 = scmp.lt.u32.totalorder %s2782_s20, %s3658_s1 }
  0x2b   : > { %p2785_p4 = pnand %p3207_p2, %p2783_p0 }
  0x2d   : > { %p2786_p5 = pneg %p2785_p4 }
  0x2f   : > { %p2791_p8 = pnand %p2789_p6, %p2786_p5 }
  0x31   : > { %2794 = shalt.err (!%p2791_p8)
}
  0x32   : > { %s2795_s7 = scalar_lea.vmem %s3185_s21, 512  ;;  %p2803_p7 = scmp.lt.s32.totalorder %s3185_s21, %s3185_s21 }
  0x33   : > { %p2796_p10 = scmp.ne.s32.totalorder %s3185_s21, %s2795_s7  ;;  %p2804_p1 = scmp.lt.s32.totalorder %s2795_s7, %s2795_s7 }
  0x35   : > { %p2798_p12 = pnand %p2796_p10, %p3207_p2  ;;  %p2805_p0 = por %p2804_p1, %p2803_p7 }
  0x37   : > { %p2799_p9 = pneg %p2798_p12 }
  0x39   : > { %p2806_p4 = pnand %p2805_p0, %p2799_p9 }
  0x3b   : > { %2809 = shalt.err (!%p2806_p4)
}
  0x3c   : > { %s3640_s24 = smov 128   ;;  %s3641_s15 = smov 8  }
  0x3d   : > { %2534 = dma.hbm_to_vmem [thread:$0]  (!%p3191_p13), %s3658_s1, 512, %s3185_s21, [#allocation6], %s3640_s24, %s3640_s24, %s3641_s15  }
  0x3e   : > { %s3660_s2 = sld [smem:[#allocation21_spill]] }
  0x44   : > { %s2810_s7 = scalar_lea.hbm %s3660_s2, 512 }
  0x45   : > { %p2811_p1 = scmp.ne.s32.totalorder %s3660_s2, %s2810_s7  ;;  %p2817_p5 = scmp.lt.u32.totalorder %s2810_s7, %s3660_s2 }
  0x47   : > { %p2813_p7 = pnand %p2811_p1, %p3207_p2 }
  0x49   : > { %p2814_p9 = pneg %p2813_p7 }
  0x4b   : > { %p2819_p6 = pnand %p2817_p5, %p2814_p9 }
  0x4d   : > { %2822 = shalt.err (!%p2819_p6)
}
  0x4e   : > { %s2823_s21 = scalar_lea.vmem %s3195_s27, 512  ;;  %p2831_p0 = scmp.lt.s32.totalorder %s3195_s27, %s3195_s27 }
  0x4f   : > { %p2824_p8 = scmp.ne.s32.totalorder %s3195_s27, %s2823_s21  ;;  %p2832_p4 = scmp.lt.s32.totalorder %s2823_s21, %s2823_s21 }
  0x51   : > { %p2826_p10 = pnand %p2824_p8, %p3207_p2  ;;  %p2833_p1 = por %p2832_p4, %p2831_p0 }
  0x53   : > { %p2827_p12 = pneg %p2826_p10 }
  0x55   : > { %p2834_p7 = pnand %p2833_p1, %p2827_p12 }
  0x57   : > { %2837 = shalt.err (!%p2834_p7)
}
  0x58   : > { %2537 = dma.hbm_to_vmem [thread:$0]  (!%p3191_p13), %s3660_s2, 512, %s3195_s27, [#allocation6], %s3640_s24, %s3640_s24, %s3641_s15  }
  0x59   : > { %s2838_s18 = scalar_lea.hbm %s3626_s5, 512 }
  0x5a   : > { %p2839_p9 = scmp.ne.s32.totalorder %s3626_s5, %s2838_s18  ;;  %p2845_p8 = scmp.lt.u32.totalorder %s2838_s18, %s3626_s5 }
  0x5c   : > { %p2841_p5 = pnand %p2839_p9, %p3207_p2 }
  0x5e   : > { %p2842_p6 = pneg %p2841_p5 }
  0x60   : > { %p2847_p10 = pnand %p2845_p8, %p2842_p6 }
  0x62   : > { %2850 = shalt.err (!%p2847_p10)
}
  0x63   : > { %s2851_s21 = scalar_lea.vmem %s267_s13, 512  ;;  %p2859_p1 = scmp.lt.s32.totalorder %s267_s13, %s267_s13 }
  0x64   : > { %p2852_p12 = scmp.ne.s32.totalorder %s267_s13, %s2851_s21  ;;  %p2860_p7 = scmp.lt.s32.totalorder %s2851_s21, %s2851_s21 }
  0x66   : > { %p2854_p0 = pnand %p2852_p12, %p3207_p2  ;;  %p2861_p3 = por %p2860_p7, %p2859_p1 }
  0x68   : > { %p2855_p4 = pneg %p2854_p0 }
  0x6a   : > { %p2862_p11 = pnand %p2861_p3, %p2855_p4 }
  0x6c   : > { %2865 = shalt.err (!%p2862_p11)
}
  0x6d   : > { %2540 = dma.hbm_to_vmem [thread:$0]  (!%p3191_p13), %s3626_s5, 512, %s267_s13, [#allocation9], %s3640_s24, %s3640_s24, %s3641_s15  }
  0x6e   : > { %s34_s6 = sadd.s32 1, %s3018_s9  ;;  %s37_s22 = sadd.s32 1, %s3022_s10 }
  0x6f   : > { %p35_p3 = scmp.ge.s32.totalorder %s34_s6, 2  ;;  %s44_s25 = sadd.s32 1, %s3006_s29 }
  0x70   : > { %p51_p11 = scmp.ne.s32.totalorder %s3006_s29, %s3002_s28  ;;  %p52_p2 = scmp.eq.s32.totalorder %s3026_s11, 0 }
  0x71   : > { %s3692_s6 = smov (%p35_p3, %s34_s6), 0  ;;  %s3694_s22 = smov (!%p35_p3, %s37_s22), %s3022_s10 }
  0x72   : > { %s194_s8 = ssub.s32 %s3018_s9, %s3692_s6  ;;  %p39_p9 = scmp.ge.s32.totalorder %s3694_s22, 2 }
  0x73   : > { %p2552_p5 = scmp.lt.s32.totalorder %s3026_s11, 4  ;;  %p3291_p13 = por %p52_p2, %p51_p11 }
  0x74   : > { %s283_s17 = sand.u32 1, %s3006_s29   ;;  %s3696_s22 = smov (%p39_p9, %s3694_s22), 0 }
  0x75   : > { %s2175_s18 = sshll.u32 %s283_s17, 4  ;;  %s41_s20 = ssub.s32 %s3022_s10, %s3696_s22 }
  0x76   : > { %p42_p6 = scmp.eq.s32.totalorder %s41_s20, 0  ;;  %s195_s23 = sor.u32 %s194_s8, %s41_s20 }
  0x77   : > { %p196_p8 = scmp.eq.s32.totalorder %s195_s23, 0  ;;  %s2229_s12 = sshll.u32 %s3022_s10, 8 }
  0x78   : > { %s3302_s7 = scalar_select %p42_p6, %s3006_s29, %s44_s25  }
  0x79   : > { %s3662_s21 = sadd.s32 1, %s2994_s26  ;;  %s3312_s15 = scalar_lea.hbm %s3621_s0, %s2229_s12 }
  0x7a   : > { %s3307_s27 = scalar_select %p196_p8, %s2994_s26, %s3662_s21  }
  0x7b   : > { %s287_s1 = scalar_lea.vmem [#allocation2], %s2175_s18  ;;  %p3320_p10 = pnand %p2552_p5, %p3291_p13 }
  0x7c   : > { %s294_s2 = sshll.u32 %s287_s1, 4  ;;  %s3324_s8 = scalar_lea.sflag [#allocation3], %s283_s17  ;;  %s3314_s2 = int_to_ptr.vmem [resolvable:$true] %s294_s2 }
  0x7d   : > { %s2866_s24 = scalar_lea.hbm %s3312_s15, 256  ;;  %p2868_p0 = pneg %p3320_p10 }
  0x7e   : > { %p2867_p12 = scmp.ne.s32.totalorder %s3312_s15, %s2866_s24  ;;  %s2871_s13 = scalar_lea.hbm %s3621_s0, 512 }
  0x7f   : > { %p2872_p7 = scmp.lt.u32.totalorder %s3312_s15, %s3621_s0  ;;  %p2873_p3 = scmp.lt.u32.totalorder %s2871_s13, %s2866_s24 }
  0x80   : > { %p2869_p4 = pnand %p2868_p0, %p2867_p12  ;;  %p2875_p2 = scmp.lt.u32.totalorder %s2866_s24, %s3312_s15 }
  0x81   : > { %p2874_p11 = por %p2873_p3, %p2872_p7 }
  0x82   : > { %p2870_p1 = pneg %p2869_p4 }
  0x83   : > { %p2876_p9 = por %p2875_p2, %p2874_p11 }
  0x85   : > { %p2877_p5 = pnand %p2876_p9, %p2870_p1 }
  0x87   : > { %2880 = shalt.err (!%p2877_p5)
}
  0x88   : > { %s2881_s17 = scalar_lea.vmem %s3314_s2, 256  ;;  %s3033_s12 = smov [#allocation2]  }
  0x89   : > { %p2882_p13 = scmp.ne.s32.totalorder %s3314_s2, %s2881_s17  ;;  %s2886_s21 = sshll.u32 %s3033_s12, 4  ;;  %s2887_s21 = int_to_ptr.vmem [resolvable:$false] %s2886_s21 }
  0x8a   : > { %s2888_s3 = scalar_lea.vmem %s2887_s21, 512  ;;  %p2889_p12 = scmp.lt.s32.totalorder %s3314_s2, %s2887_s21 }
  0x8b   : > { %p2884_p6 = pnand %p2882_p13, %p2868_p0  ;;  %p2890_p4 = scmp.lt.s32.totalorder %s2888_s3, %s2881_s17 }
  0x8d   : > { %p2885_p8 = pneg %p2884_p6  ;;  %p2891_p7 = por %p2890_p4, %p2889_p12 }
  0x8f   : > { %p2892_p3 = pnand %p2891_p7, %p2885_p8 }
  0x91   : > { %2895 = shalt.err (!%p2892_p3)
}
  0x92   : > { %s3664_s24 = smov 8   ;;  %s3665_s1 = smov 128  }
  0x93   : > { %2544 = dma.hbm_to_vmem [thread:$0]  (!%p3320_p10), %s3312_s15, 256, %s3314_s2, %s3324_s8, %s3665_s1, %s3665_s1, %s3664_s24  }
  0x94   : > { %p3666_p0 = scmp.ne.s32.totalorder %s3656_s19, 0 }
  0x95   : > { %s308_s18 = sand.u32 (!%p3666_p0), 1, %s3002_s28   ;;  %p3667_p1 = scmp.ne.s32.totalorder (!%p3666_p0), %s3651_s16, 0 }
  0x96   : > { %306 = sbr.rel (%p3666_p0) target bundleno = 4702 (0x125e), region = 48  ;;  %s2179_s13 = sshll.u32 (!%p3666_p0), %s308_s18, 4 }
  0x97   : > { %s309_s20 = scalar_lea.sflag (!%p3666_p0), [#allocation3], %s308_s18  ;;  %s3358_s23 = scalar_lea.vmem (!%p3666_p0), [#allocation2], %s2179_s13 }
  0x9d   : > { %2969 = dma.done.wait (%p3667_p1), %s309_s20, 256  }
  0x9e   : > { %2971 = vsyncadd (%p3667_p1), %s309_s20, 4294967040  ;;  %p3668_p11 = scmp.ne.s32.totalorder %s3650_s14, 0 }
  0xa0   : > { %2973 = dma.done.wait (%p3668_p11), [#allocation6], 1024  }
  0xa1   : > { %2975 = vsyncadd (%p3668_p11), [#allocation6], 4294966272 }
  0xa2   : > { %2977 = dma.done.wait (%p3668_p11), [#allocation9], 512  }
  0xa3   : > { %2979 = vsyncadd (%p3668_p11), [#allocation9], 4294966784  ;;  %v3034_v0 = vmov 0.0|0.0   ;;  %vm3035_vm0 = vmmov 0   ;;  %v3036_v1 = vmov 0.0   ;;  %vm371_vm1 = vcmask 261120  }
  0xa4   : > { %2439 = vmatprep.subr.bf16.mxu0 %v3034_v0  ;;  %2302 = vmatprep.mubr.msk.f32.mxu0 %vm3035_vm0, %v3036_v1  ;;  %v445_v2 = vld [vmem:[#allocation7] sm:$0xff]  ;;  %v446_v3 = vld [vmem:[#allocation7 + $0x8] sm:$0xff]  ;;  %v447_v4 = vld [vmem:[#allocation7 + $0x10] sm:$0xff]  ;;  %s2184_s2 = sshll.u32 %s3010_s30, 3  ;;  %vm537_vm2 = vcmask 31744   ;;  %s3037_s15 = smov 96  }
  0xa5   : > { %v2445_v5 = vpack.c.bf16 %v446_v3, %v445_v2  ;;  %v448_v6 = vld [vmem:[#allocation7 + $0x18] sm:$0xff]  ;;  %v356_v7 = vld [vmem:[%s3358_s23] sm:$0xff]  ;;  %v361_v10 = vld [vmem:[#allocation5 + $0x8] sm:$0xff]  ;;  %s358_s14 = scalar_lea.vmem %s3358_s23, %s2184_s2 [#allocation2]  ;;  %s3671_s17 = sld [smem:[#allocation22_spill]]  ;;  %vm617_vm4 = vcmask 130048   ;;  %vm1941_vm5 = vcmask 64512  }
  0xa6   : > { %v2449_v8 = vpack.c.bf16 %v448_v6, %v447_v4  ;;  %2313 = vmatprep.mubr.msk.f32.mxu1 %vm371_vm1, %v356_v7  ;;  %v360_v9 = vld [vmem:[#allocation5] sm:$0xff]  ;;  %v362_v11 = vld [vmem:[#allocation5 + $0x10] sm:$0xff]  ;;  %v363_v13 = vld [vmem:[#allocation5 + $0x18] sm:$0xff]  ;;  %s3038_s12 = smov 124   ;;  %s3039_s21 = smov 120   ;;  %vm1943_vm6 = vcmask 97280  }
  0xa7   : > { %2446 = vmatprep.subr.bf16.mxu1 %v2445_v5  ;;  %v2440_v12 = vpack.c.bf16 %v361_v10, %v360_v9  ;;  %v2443_v14 = vpack.c.bf16 %v363_v13, %v362_v11  ;;  %v357_v15 = vld [vmem:[%s3358_s23 + $0x8] sm:$0xff]  ;;  %v3381_v16 = vld [vmem:[%s358_s14] sm:$0xff]  ;;  %vm3397_vm3 = vmpackc.low %vm537_vm2, %vm537_vm2  ;;  %s3040_s3 = smov 88   ;;  %s3041_s24 = smov 92   ;;  %vm1946_vm7 = vcmask 162816   ;;  %vm1948_vm8 = vcmask 195584  }
  0xa8   : > { %2448 = vmatpush3.bf16.msra.mxu1 %v2445_v5  ;;  %v2187_v17 = vld [vmem:[%s3625_s4] ss:$0 sm:$0xff]  ;;  %s3042_s1 = smov 116   ;;  %s3043_s18 = smov 84   ;;  %vm1950_vm9 = vcmask 228352  }
  0xa9   : > { %2450 = vmatprep.subr.bf16.mxu1 %v2449_v8  ;;  %2441 = vmatpush3.bf16.msra.mxu0 %v2440_v12  ;;  %s3044_s13 = smov 112   ;;  %s3045_s20 = smov 108  }
  0xaa   : > { %2442 = vmatprep.subr.bf16.mxu0 %v3034_v0  ;;  %s3046_s23 = smov 80   ;;  %s3047_s2 = smov 76  }
  0xab   : > { %v2185_v27 = vld [vmem:[%s3671_s17] ss:$0 sm:$0xff]  ;;  %s3048_s14 = smov 104   ;;  %s3049_s16 = smov 100  }
  0xac   : > { %2452 = vmatpush3.bf16.msra.mxu1 %v2449_v8  ;;  %s3050_s19 = smov 72   ;;  %s3052_s25 = smov 8  }
  0xad   : > { %2444 = vmatpush3.bf16.msra.mxu0 %v2443_v14  ;;  %2457 = vmatprep.subr.bf16.mxu1 %v3034_v0  ;;  %s3053_s8 = smov 16   ;;  %s3054_s17 = smov 24  }
  0xae   : > { %2453 = vmatprep.subr.bf16.mxu0 %v3034_v0 }
  0xaf   : > { %2314 = vmatmul.mubr.msk.f32.vlgmr.msra.gmra.mrb[0].mxu1 %vm371_vm1, %v357_v15 }
  0xb0   : > { %2303 = vmatmul.mubr.msk.f32.vlgmr.msra.gmra.mrb[0].mxu0 %vm371_vm1, %v3381_v16  ;;  %2327 = vmatprep.mubr.msk.f32.mxu1 %vm3035_vm0, %v3036_v1 }
  0xb1   : > { %2320 = vmatprep.mubr.msk.f32.mxu0 %vm3035_vm0, %v3036_v1 }
 0x182   : > { %v2315_v18 = vpop.f32.mrb[0].mxu1 }
 0x183   : > { %v534_v19 = vadd.f32 %v2315_v18, %v2187_v17  ;;  %v528_v20 = vpop.f32.mrb[1].mxu1  ;;  %v441_v21 = vpop.f32.mrb[0].mxu0 }
 0x184   : > { %v529_v22 = vadd.f32 %v2187_v17, %v528_v20  ;;  %v2304_v23 = vpop.f32.mrb[1].mxu0  ;;  %v3410_v28 = vadd.f32 %v2185_v27, %v441_v21 }
 0x186   : > { %v3401_v25 = vpack.i.bf16 %v534_v19, %v529_v22  ;;  %v2454_v26 = vpack.c.bf16 %v534_v19, %v529_v22 }
 0x188   : > { %2676 = vrot.lane.b32.xlu1 %v3401_v25, %s3037_s15  ;;  %2456 = vmatpush3.bf16.xpose.msk.msra.mxu0 %vm3397_vm3, %v2454_v26  ;;  %s3051_s15 = smov 68  }
 0x189   : > { %2467 = vmatprep.subr.bf16.mxu0 %v3034_v0 }
 0x18c   : > { %2681 = vrot.lane.b32.xlu1 %v3401_v25, %s3038_s12 }
 0x18f   : > { %2321 = vmatmul.mubr.msk.f32.vlgmr.msra.gmra.mrb[2].mxu0 %vm537_vm2, %v3410_v28 }
 0x190   : > { %2686 = vrot.lane.b32.xlu1 %v3401_v25, %s3039_s21  ;;  %2348 = vmatprep.mubr.msk.f32.mxu0 %vm3035_vm0, %v3036_v1 }
 0x194   : > { %880 = vrot.lane.b32.xlu1 %v3410_v28, %s3039_s21  ;;  %s3056_s21 = smov 12  }
 0x1fa   : > { %v2677_v29 = vpop.permute.xlu1 %2676 }
 0x1fb   : > { %v2679_v30 = vunpack.i.h.bf16 %v2677_v29  ;;  %v2678_v31 = vunpack.i.l.bf16 %v2677_v29 }
 0x1fd   : > { %v2458_v32 = vpack.c.bf16 %v2679_v30, %v2678_v31 }
 0x1fe   : > { %v2682_v33 = vpop.permute.xlu1 %2681 }
 0x1ff   : > { %2459 = vmatpush3.bf16.msra.mxu1 %v2458_v32  ;;  %v2684_v51 = vunpack.i.h.bf16 %v2682_v33  ;;  %v2683_v52 = vunpack.i.l.bf16 %v2682_v33 }
 0x200   : > { %2460 = vmatprep.subr.bf16.mxu1 %v3034_v0 }
 0x201   : > { %v2461_v55 = vpack.c.bf16 %v2684_v51, %v2683_v52 }
 0x202   : > { %v2687_v34 = vpop.permute.xlu1 %2686 }
 0x203   : > { %v2689_v35 = vunpack.i.h.bf16 %v2687_v34  ;;  %v2688_v36 = vunpack.i.l.bf16 %v2687_v34 }
 0x205   : > { %v2468_v37 = vpack.c.bf16 %v2689_v35, %v2688_v36 }
 0x206   : > { %v881_v38 = vpop.permute.xlu1 %880 }
 0x207   : > { %2470 = vmatpush3.bf16.xpose.msk.msra.mxu0 %vm3397_vm3, %v2468_v37 }
 0x208   : > { %2478 = vmatprep.subr.bf16.mxu0 %v3034_v0 }
 0x20e   : > { %2349 = vmatmul.mubr.msk.f32.vlgmr.msra.gmra.mrb[4].mxu0 %vm537_vm2, %v881_v38 }
 0x20f   : > { %2369 = vmatprep.mubr.msk.f32.mxu0 %vm3035_vm0, %v3036_v1 }
 0x262   : > { %v613_v39 = vpop.f32.mrb[2].mxu0 }
 0x263   : > { %v2322_v40 = vpop.f32.mrb[3].mxu0  ;;  %v618_v41 = vsel %vm617_vm4, %v613_v39, -inf }
 0x264   : > { %619 = vmax.xlane.f32.xlu0 %v618_v41 }
 0x2e1   : > { %v958_v42 = vpop.f32.mrb[4].mxu0 }
 0x2e2   : > { %v2350_v43 = vpop.f32.mrb[5].mxu0  ;;  %v962_v49 = vsel %vm617_vm4, %v958_v42, -inf }
 0x2f1   : > { %v620_v44 = vpop.xlane.xlu0 %619 }
 0x2f2   : > { %v621_v45 = vsub.f32 %v613_v39, %v620_v44 }
 0x2f4   : > { %v622_v46 = vmul.f32 1.442695, %v621_v45 }
 0x2f6   : > { %2750 = vpow2.f32 %v622_v46 }
 0x300   : > { %v2751_v47 = vpop.eup %2750 }
 0x301   : > { %v624_v48 = vsel %vm617_vm4, %v2751_v47, 0.0 }
 0x302   : > { %625 = vadd.xlane.f32.xlu0 %v624_v48 }
 0x318   : > { %708 = vrot.lane.b32.xlu0 %v3410_v28, %s3038_s12  ;;  %s3055_s12 = smov 4  }
 0x337   : > { %963 = vmax.xlane.f32.xlu0 %v962_v49 }
 0x34d   : > { %2696 = vrot.lane.b32.xlu0 %v3401_v25, %s3040_s3  ;;  %s3057_s3 = smov 20  }
 0x38f   : > { %v626_v50 = vpop.xlane.xlu0 %625 }
 0x390   : > { %2752 = vrcp.f32 %v626_v50 }
 0x393   : > { %v709_v56 = vpop.permute.xlu0 %708 }
 0x39a   : > { %v2753_v53 = vpop.eup %2752 }
 0x39b   : > { %v628_v54 = vmul.f32 %v2753_v53, %v2751_v47 }
 0x39d   : > { %2328 = vmatmul.mubr.msk.f32.vlgmr.msra.gmra.mrb[2].mxu1 %vm617_vm4, %v628_v54 }
 0x39e   : > { %2463 = vmatpush3.bf16.xpose.msk.msra.mxu1 %vm3397_vm3, %v2461_v55  ;;  %2334 = vmatprep.mubr.msk.f32.mxu1 %vm3035_vm0, %v3036_v1 }
 0x39f   : > { %2464 = vmatprep.subr.bf16.mxu1 %v3034_v0 }
 0x3a5   : > { %2335 = vmatmul.mubr.msk.f32.vlgmr.msra.gmra.mrb[4].mxu1 %vm537_vm2, %v709_v56 }
 0x3a6   : > { %2341 = vmatprep.mubr.msk.f32.mxu1 %vm3035_vm0, %v3036_v1 }
 0x3c4   : > { %v964_v57 = vpop.xlane.xlu0 %963 }
 0x3c5   : > { %v965_v58 = vsub.f32 %v958_v42, %v964_v57 }
 0x3c7   : > { %v966_v59 = vmul.f32 1.442695, %v965_v58 }
 0x3c8   : > { %v2697_v17 = vpop.permute.xlu0 %2696 }
 0x3c9   : > { %2754 = vpow2.f32 %v966_v59  ;;  %v2699_v18 = vunpack.i.h.bf16 %v2697_v17  ;;  %v2698_v19 = vunpack.i.l.bf16 %v2697_v17 }
 0x3cb   : > { %v2472_v23 = vpack.c.bf16 %v2699_v18, %v2698_v19 }
 0x3d3   : > { %v2755_v3 = vpop.eup %2754 }
 0x3d4   : > { %v968_v4 = vsel %vm617_vm4, %v2755_v3, 0.0 }
 0x470   : > { %v3442_v60 = vpop.f32.mrb[2].mxu1 }
 0x471   : > { %v2329_v61 = vpop.f32.mrb[3].mxu1 }
 0x478   : > { %v786_v62 = vpop.f32.mrb[4].mxu1 }
 0x479   : > { %v2336_v63 = vpop.f32.mrb[5].mxu1  ;;  %v790_v2 = vsel %vm617_vm4, %v786_v62, -inf }
 0x47a   : > { %791 = vmax.xlane.f32.xlu1 %v790_v2 }
 0x47e   : > { %969 = vadd.xlane.f32.xlu1 %v968_v4 }
 0x48f   : > { %2691 = vrot.lane.b32.xlu1 %v3401_v25, %s3041_s24  ;;  %s3058_s24 = smov 28  }
 0x507   : > { %v792_v5 = vpop.xlane.xlu1 %791 }
 0x508   : > { %v793_v6 = vsub.f32 %v786_v62, %v792_v5 }
 0x50a   : > { %v794_v7 = vmul.f32 1.442695, %v793_v6 }
 0x50b   : > { %v970_v8 = vpop.xlane.xlu1 %969 }
 0x50c   : > { %2756 = vpow2.f32 %v794_v7 }
 0x50f   : > { %v2692_v9 = vpop.permute.xlu1 %2691 }
 0x510   : > { %v2694_v10 = vunpack.i.h.bf16 %v2692_v9  ;;  %v2693_v11 = vunpack.i.l.bf16 %v2692_v9 }
 0x512   : > { %v2465_v12 = vpack.c.bf16 %v2694_v10, %v2693_v11 }
 0x514   : > { %2466 = vmatpush3.bf16.msra.mxu1 %v2465_v12 }
 0x515   : > { %2471 = vmatprep.subr.bf16.mxu1 %v3034_v0 }
 0x516   : > { %v2757_v13 = vpop.eup %2756 }
 0x517   : > { %v796_v14 = vsel %vm617_vm4, %v2757_v13, 0.0 }
 0x518   : > { %797 = vadd.xlane.f32.xlu1 %v796_v14 }
 0x529   : > { %2701 = vrot.lane.b32.xlu1 %v3401_v25, %s3042_s1 }
 0x52d   : > { %1052 = vrot.lane.b32.xlu1 %v3410_v28, %s3042_s1  ;;  %s3672_s1 = sld [smem:[#allocation16_spill]] }
 0x5a5   : > { %v798_v15 = vpop.xlane.xlu1 %797 }
 0x5a6   : > { %2758 = vrcp.f32 %v798_v15 }
 0x5a7   : > { %2760 = vrcp.f32 %v970_v8 }
 0x5a9   : > { %v2702_v26 = vpop.permute.xlu1 %2701 }
 0x5aa   : > { %v2704_v29 = vunpack.i.h.bf16 %v2702_v26  ;;  %v2703_v30 = vunpack.i.l.bf16 %v2702_v26 }
 0x5ac   : > { %v2475_v31 = vpack.c.bf16 %v2704_v29, %v2703_v30 }
 0x5ad   : > { %v1053_v32 = vpop.permute.xlu1 %1052 }
 0x5b0   : > { %v2759_v20 = vpop.eup %2758 }
 0x5b1   : > { %v800_v21 = vmul.f32 %v2759_v20, %v2757_v13  ;;  %v2761_v22 = vpop.eup %2760 }
 0x5b2   : > { %v972_v27 = vmul.f32 %v2761_v22, %v2755_v3 }
 0x5b3   : > { %2342 = vmatmul.mubr.msk.f32.vlgmr.msra.gmra.mrb[6].mxu1 %vm617_vm4, %v800_v21 }
 0x5b4   : > { %2473 = vmatpush3.bf16.msra.mxu1 %v2472_v23  ;;  %2355 = vmatprep.mubr.msk.f32.mxu1 %vm3035_vm0, %v3036_v1 }
 0x5b5   : > { %2474 = vmatprep.subr.bf16.mxu1 %v3034_v0 }
 0x5b7   : > { %2356 = vmatmul.mubr.msk.f32.vlgmr.msra.gmra.mrb[8].mxu1 %vm617_vm4, %v972_v27 }
 0x5b8   : > { %2362 = vmatprep.mubr.msk.f32.mxu1 %vm3035_vm0, %v3036_v1 }
 0x5bd   : > { %2477 = vmatpush3.bf16.xpose.msk.msra.mxu1 %vm3397_vm3, %v2475_v31 }
 0x5be   : > { %2485 = vmatprep.subr.bf16.mxu1 %v3034_v0 }
 0x5c4   : > { %2363 = vmatmul.mubr.msk.f32.vlgmr.msra.gmra.mrb[10].mxu1 %vm537_vm2, %v1053_v32 }
 0x5c5   : > { %2383 = vmatprep.mubr.msk.f32.mxu1 %vm3035_vm0, %v3036_v1 }
 0x686   : > { %v3464_v33 = vpop.f32.mrb[6].mxu1 }
 0x687   : > { %v2343_v34 = vpop.f32.mrb[7].mxu1 }
 0x68a   : > { %v3466_v35 = vpop.f32.mrb[8].mxu1 }
 0x68b   : > { %v2357_v36 = vpop.f32.mrb[9].mxu1 }
 0x697   : > { %v1130_v37 = vpop.f32.mrb[10].mxu1 }
 0x698   : > { %v2364_v38 = vpop.f32.mrb[11].mxu1  ;;  %v1134_v39 = vsel %vm617_vm4, %v1130_v37, -inf }
 0x699   : > { %1135 = vmax.xlane.f32.xlu0 %v1134_v39 }
 0x6af   : > { %2706 = vrot.lane.b32.xlu0 %v3401_v25, %s3043_s18  ;;  %s3673_s18 = sld [smem:[#allocation17_spill]] }
 0x6b3   : > { %1224 = vrot.lane.b32.xlu0 %v3410_v28, %s3044_s13 }
 0x726   : > { %v1136_v40 = vpop.xlane.xlu0 %1135 }
 0x727   : > { %v1137_v41 = vsub.f32 %v1130_v37, %v1136_v40 }
 0x729   : > { %v1138_v42 = vmul.f32 1.442695, %v1137_v41 }
 0x72a   : > { %v2707_v43 = vpop.permute.xlu0 %2706 }
 0x72b   : > { %2762 = vpow2.f32 %v1138_v42  ;;  %v2709_v44 = vunpack.i.h.bf16 %v2707_v43  ;;  %v2708_v45 = vunpack.i.l.bf16 %v2707_v43 }
 0x72d   : > { %v2479_v46 = vpack.c.bf16 %v2709_v44, %v2708_v45 }
 0x72e   : > { %v1225_v56 = vpop.permute.xlu0 %1224 }
 0x72f   : > { %2480 = vmatpush3.bf16.msra.mxu0 %v2479_v46 }
 0x730   : > { %2481 = vmatprep.subr.bf16.mxu0 %v3034_v0 }
 0x735   : > { %v2763_v47 = vpop.eup %2762 }
 0x736   : > { %v1140_v48 = vsel %vm617_vm4, %v2763_v47, 0.0 }
 0x737   : > { %1141 = vadd.xlane.f32.xlu1 %v1140_v48 }
 0x748   : > { %2711 = vrot.lane.b32.xlu1 %v3401_v25, %s3044_s13  ;;  %s352_s13 = sand.u32 1, %s3672_s1  }
 0x7c4   : > { %v1142_v49 = vpop.xlane.xlu1 %1141 }
 0x7c5   : > { %2764 = vrcp.f32 %v1142_v49 }
 0x7c8   : > { %v2712_v50 = vpop.permute.xlu1 %2711 }
 0x7c9   : > { %v2714_v51 = vunpack.i.h.bf16 %v2712_v50  ;;  %v2713_v52 = vunpack.i.l.bf16 %v2712_v50 }
 0x7cb   : > { %v2482_v55 = vpack.c.bf16 %v2714_v51, %v2713_v52 }
 0x7cf   : > { %v2765_v53 = vpop.eup %2764 }
 0x7d0   : > { %v1144_v54 = vmul.f32 %v2765_v53, %v2763_v47 }
 0x7d2   : > { %2370 = vmatmul.mubr.msk.f32.vlgmr.msra.gmra.mrb[6].mxu0 %vm617_vm4, %v1144_v54 }
 0x7d3   : > { %2484 = vmatpush3.bf16.xpose.msk.msra.mxu0 %vm3397_vm3, %v2482_v55  ;;  %2376 = vmatprep.mubr.msk.f32.mxu0 %vm3035_vm0, %v3036_v1 }
 0x7d4   : > { %2492 = vmatprep.subr.bf16.mxu0 %v3034_v0 }
 0x7da   : > { %2377 = vmatmul.mubr.msk.f32.vlgmr.msra.gmra.mrb[8].mxu0 %vm537_vm2, %v1225_v56 }
 0x7db   : > { %2397 = vmatprep.mubr.msk.f32.mxu0 %vm3035_vm0, %v3036_v1 }
 0x8a5   : > { %v3483_v57 = vpop.f32.mrb[6].mxu0 }
 0x8a6   : > { %v2371_v58 = vpop.f32.mrb[7].mxu0 }
 0x8ad   : > { %v1302_v59 = vpop.f32.mrb[8].mxu0 }
 0x8ae   : > { %v2378_v61 = vpop.f32.mrb[9].mxu0  ;;  %v1306_v62 = vsel %vm617_vm4, %v1302_v59, -inf }
 0x8af   : > { %1307 = vmax.xlane.f32.xlu1 %v1306_v62 }
 0x8c0   : > { %2721 = vrot.lane.b32.xlu1 %v3401_v25, %s3045_s20 }
 0x8c4   : > { %1396 = vrot.lane.b32.xlu1 %v3410_v28, %s3045_s20  ;;  %s2183_s20 = sshll.u32 %s352_s13, 3 }
 0x93c   : > { %v1308_v63 = vpop.xlane.xlu1 %1307 }
 0x93d   : > { %v1309_v2 = vsub.f32 %v1302_v59, %v1308_v63 }
 0x93f   : > { %v1310_v3 = vmul.f32 1.442695, %v1309_v2 }
 0x940   : > { %v2722_v11 = vpop.permute.xlu1 %2721 }
 0x941   : > { %2766 = vpow2.f32 %v1310_v3  ;;  %v2724_v13 = vunpack.i.h.bf16 %v2722_v11  ;;  %v2723_v14 = vunpack.i.l.bf16 %v2722_v11 }
 0x943   : > { %v2489_v17 = vpack.c.bf16 %v2724_v13, %v2723_v14 }
 0x944   : > { %v1397_v18 = vpop.permute.xlu1 %1396 }
 0x94b   : > { %v2767_v4 = vpop.eup %2766 }
 0x94c   : > { %v1312_v5 = vsel %vm617_vm4, %v2767_v4, 0.0 }
 0x94d   : > { %1313 = vadd.xlane.f32.xlu0 %v1312_v5 }
 0x963   : > { %2716 = vrot.lane.b32.xlu0 %v3401_v25, %s3046_s23  ;;  %s2225_s23 = sshll.u32 %s3673_s18, 1  ;;  %s3059_s18 = smov [#allocation10]  }
 0x9da   : > { %v1314_v6 = vpop.xlane.xlu0 %1313 }
 0x9db   : > { %2768 = vrcp.f32 %v1314_v6 }
 0x9de   : > { %v2717_v7 = vpop.permute.xlu0 %2716 }
 0x9df   : > { %v2719_v8 = vunpack.i.h.bf16 %v2717_v7  ;;  %v2718_v9 = vunpack.i.l.bf16 %v2717_v7 }
 0x9e1   : > { %v2486_v10 = vpack.c.bf16 %v2719_v8, %v2718_v9 }
 0x9e3   : > { %2487 = vmatpush3.bf16.msra.mxu1 %v2486_v10 }
 0x9e4   : > { %2488 = vmatprep.subr.bf16.mxu1 %v3034_v0 }
 0x9e5   : > { %v2769_v12 = vpop.eup %2768 }
 0x9e6   : > { %v1316_v15 = vmul.f32 %v2769_v12, %v2767_v4 }
 0x9e8   : > { %2384 = vmatmul.mubr.msk.f32.vlgmr.msra.gmra.mrb[12].mxu1 %vm617_vm4, %v1316_v15 }
 0x9e9   : > { %2390 = vmatprep.mubr.msk.f32.mxu1 %vm3035_vm0, %v3036_v1 }
 0x9ec   : > { %2491 = vmatpush3.bf16.xpose.msk.msra.mxu1 %vm3397_vm3, %v2489_v17 }
 0x9ed   : > { %2499 = vmatprep.subr.bf16.mxu1 %v3034_v0 }
 0x9f3   : > { %2391 = vmatmul.mubr.msk.f32.vlgmr.msra.gmra.mrb[14].mxu1 %vm537_vm2, %v1397_v18 }
 0x9f4   : > { %2411 = vmatprep.mubr.msk.f32.mxu1 %vm3035_vm0, %v3036_v1 }
 0xabb   : > { %v3500_v19 = vpop.f32.mrb[12].mxu1 }
 0xabc   : > { %v2385_v20 = vpop.f32.mrb[13].mxu1 }
 0xac6   : > { %v1474_v21 = vpop.f32.mrb[14].mxu1 }
 0xac7   : > { %v2392_v22 = vpop.f32.mrb[15].mxu1  ;;  %v1478_v23 = vsel %vm617_vm4, %v1474_v21, -inf }
 0xac8   : > { %1479 = vmax.xlane.f32.xlu0 %v1478_v23  ;;  %v1952_v22 = vld [vmem:[#allocation8] sm:$0xff]  ;;  %v1953_v23 = vld [vmem:[#allocation8 + $0x8] sm:$0xff] }
 0xade   : > { %2726 = vrot.lane.b32.xlu0 %v3401_v25, %s3047_s2  ;;  %s3674_s2 = sld [smem:[#allocation18_spill]] }
 0xae2   : > { %1568 = vrot.lane.b32.xlu0 %v3410_v28, %s3048_s14 }
 0xae4   : > { %p3677_p2 = scmp.ne.s32.totalorder %s3674_s2, 0 }
 0xb55   : > { %v1480_v26 = vpop.xlane.xlu0 %1479 }
 0xb56   : > { %v1481_v27 = vsub.f32 %v1474_v21, %v1480_v26  ;;  %v1954_v26 = vld [vmem:[#allocation8 + $0x10] sm:$0xff] }
 0xb58   : > { %v1482_v29 = vmul.f32 1.442695, %v1481_v27  ;;  %v2510_v27 = vpack.c.bf16 %v1953_v23, %v1952_v22 }
 0xb59   : > { %v2727_v30 = vpop.permute.xlu0 %2726 }
 0xb5a   : > { %2770 = vpow2.f32 %v1482_v29  ;;  %v2729_v31 = vunpack.i.h.bf16 %v2727_v30  ;;  %v2728_v32 = vunpack.i.l.bf16 %v2727_v30 }
 0xb5c   : > { %v2493_v34 = vpack.c.bf16 %v2729_v31, %v2728_v32 }
 0xb5d   : > { %v1569_v45 = vpop.permute.xlu0 %1568 }
 0xb5e   : > { %2494 = vmatpush3.bf16.msra.mxu0 %v2493_v34 }
 0xb5f   : > { %2495 = vmatprep.subr.bf16.mxu0 %v3034_v0 }
 0xb64   : > { %v2771_v36 = vpop.eup %2770 }
 0xb65   : > { %v1484_v37 = vsel %vm617_vm4, %v2771_v36, 0.0 }
 0xb66   : > { %1485 = vadd.xlane.f32.xlu1 %v1484_v37 }
 0xb77   : > { %2731 = vrot.lane.b32.xlu1 %v3401_v25, %s3048_s14  ;;  %s2050_s14 = sadd.s32 %s3010_s30, %s2225_s23  ;;  %s2039_s30 = scalar_lea.sflag [#allocation4], %s352_s13 }
 0xbf3   : > { %v1486_v38 = vpop.xlane.xlu1 %1485 }
 0xbf4   : > { %2772 = vrcp.f32 %v1486_v38 }
 0xbf7   : > { %v2732_v39 = vpop.permute.xlu1 %2731 }
 0xbf8   : > { %v2734_v40 = vunpack.i.h.bf16 %v2732_v39  ;;  %v2733_v41 = vunpack.i.l.bf16 %v2732_v39 }
 0xbfa   : > { %v2496_v44 = vpack.c.bf16 %v2734_v40, %v2733_v41 }
 0xbfe   : > { %v2773_v42 = vpop.eup %2772 }
 0xbff   : > { %v1488_v43 = vmul.f32 %v2773_v42, %v2771_v36 }
 0xc01   : > { %2398 = vmatmul.mubr.msk.f32.vlgmr.msra.gmra.mrb[10].mxu0 %vm617_vm4, %v1488_v43 }
 0xc02   : > { %2498 = vmatpush3.bf16.xpose.msk.msra.mxu0 %vm3397_vm3, %v2496_v44  ;;  %2404 = vmatprep.mubr.msk.f32.mxu0 %vm3035_vm0, %v3036_v1 }
 0xc03   : > { %2506 = vmatprep.subr.bf16.mxu0 %v3034_v0 }
 0xc09   : > { %2405 = vmatmul.mubr.msk.f32.vlgmr.msra.gmra.mrb[12].mxu0 %vm537_vm2, %v1569_v45 }
 0xc0a   : > { %2425 = vmatprep.mubr.msk.f32.mxu0 %vm3035_vm0, %v3036_v1 }
 0xcd4   : > { %v3517_v46 = vpop.f32.mrb[10].mxu0 }
 0xcd5   : > { %v2399_v47 = vpop.f32.mrb[11].mxu0 }
 0xcdc   : > { %v1646_v48 = vpop.f32.mrb[12].mxu0 }
 0xcdd   : > { %v2406_v49 = vpop.f32.mrb[13].mxu0  ;;  %v1650_v50 = vsel %vm617_vm4, %v1646_v48, -inf }
 0xcde   : > { %1651 = vmax.xlane.f32.xlu1 %v1650_v50 }
 0xcef   : > { %2741 = vrot.lane.b32.xlu1 %v3401_v25, %s3049_s16 }
 0xcf3   : > { %1740 = vrot.lane.b32.xlu1 %v3410_v28, %s3049_s16 }
 0xd6b   : > { %v1652_v51 = vpop.xlane.xlu1 %1651 }
 0xd6c   : > { %v1653_v52 = vsub.f32 %v1646_v48, %v1652_v51 }
 0xd6e   : > { %v1654_v53 = vmul.f32 1.442695, %v1653_v52 }
 0xd6f   : > { %v2742_v63 = vpop.permute.xlu1 %2741 }
 0xd70   : > { %2774 = vpow2.f32 %v1654_v53  ;;  %v2744_v2 = vunpack.i.h.bf16 %v2742_v63  ;;  %v2743_v3 = vunpack.i.l.bf16 %v2742_v63 }
 0xd72   : > { %v2503_v5 = vpack.c.bf16 %v2744_v2, %v2743_v3 }
 0xd73   : > { %v1741_v6 = vpop.permute.xlu1 %1740 }
 0xd7a   : > { %v2775_v54 = vpop.eup %2774 }
 0xd7b   : > { %v1656_v55 = vsel %vm617_vm4, %v2775_v54, 0.0 }
 0xd7c   : > { %1657 = vadd.xlane.f32.xlu0 %v1656_v55 }
 0xd92   : > { %2736 = vrot.lane.b32.xlu0 %v3401_v25, %s3050_s19 }
 0xe09   : > { %v1658_v56 = vpop.xlane.xlu0 %1657 }
 0xe0a   : > { %2776 = vrcp.f32 %v1658_v56 }
 0xe0d   : > { %v2737_v58 = vpop.permute.xlu0 %2736 }
 0xe0e   : > { %v2739_v59 = vunpack.i.h.bf16 %v2737_v58  ;;  %v2738_v61 = vunpack.i.l.bf16 %v2737_v58 }
 0xe10   : > { %v2500_v62 = vpack.c.bf16 %v2739_v59, %v2738_v61 }
 0xe12   : > { %2501 = vmatpush3.bf16.msra.mxu1 %v2500_v62 }
 0xe13   : > { %2502 = vmatprep.subr.bf16.mxu1 %v3034_v0 }
 0xe14   : > { %v2777_v28 = vpop.eup %2776 }
 0xe15   : > { %v1660_v4 = vmul.f32 %v2777_v28, %v2775_v54 }
 0xe17   : > { %2412 = vmatmul.mubr.msk.f32.vlgmr.msra.gmra.mrb[16].mxu1 %vm617_vm4, %v1660_v4 }
 0xe18   : > { %2418 = vmatprep.mubr.msk.f32.mxu1 %vm3035_vm0, %v3036_v1 }
 0xe1b   : > { %2505 = vmatpush3.bf16.xpose.msk.msra.mxu1 %vm3397_vm3, %v2503_v5 }
 0xe22   : > { %2419 = vmatmul.mubr.msk.f32.vlgmr.msra.gmra.mrb[18].mxu1 %vm537_vm2, %v1741_v6 }
 0xeea   : > { %v1736_v7 = vpop.f32.mrb[16].mxu1 }
 0xeeb   : > { %v2413_v8 = vpop.f32.mrb[17].mxu1 }
 0xef5   : > { %v1818_v9 = vpop.f32.mrb[18].mxu1 }
 0xef6   : > { %v2420_v10 = vpop.f32.mrb[19].mxu1  ;;  %v1822_v11 = vsel %vm617_vm4, %v1818_v9, -inf }
 0xef7   : > { %1823 = vmax.xlane.f32.xlu0 %v1822_v11 }
 0xf0d   : > { %2746 = vrot.lane.b32.xlu0 %v3401_v25, %s3051_s15  ;;  %s3675_s15 = sld [smem:[#allocation23_spill]] }
 0xf11   : > { %1917 = vrot.lane.b32.xlu0 %v3466_v35, %s3052_s25  ;;  %s2226_s25 = sshll.u32 %s2050_s14, 7 }
 0xf15   : > { %1925 = vrot.lane.b32.xlu0 %v3500_v19, %s3053_s8  ;;  %s354_s8 = scalar_lea.vmem [#allocation10], %s2183_s20  ;;  %s2900_s20 = sshll.u32 %s3059_s18, 4  ;;  %s2901_s20 = int_to_ptr.vmem [resolvable:$false] %s2900_s20 }
 0xf16   : > { %s2902_s23 = scalar_lea.vmem %s2901_s20, 256 }
 0xf19   : > { %1933 = vrot.lane.b32.xlu0 %v1736_v7, %s3054_s17  ;;  %s2054_s17 = sshll.u32 %s354_s8, 4  ;;  %s3560_s17 = int_to_ptr.vmem [resolvable:$true] %s2054_s17 }
 0xf1a   : > { %s2896_s1 = scalar_lea.vmem %s3560_s17, 128  ;;  %p2903_p13 = scmp.lt.s32.totalorder %s3560_s17, %s2901_s20 }
 0xf1b   : > { %p2897_p10 = scmp.ne.s32.totalorder %s3560_s17, %s2896_s1  ;;  %p2904_p6 = scmp.lt.s32.totalorder %s2902_s23, %s2896_s1 }
 0xf1d   : > { %p2898_p9 = pnand %p2897_p10, %p3677_p2  ;;  %p2905_p8 = por %p2904_p6, %p2903_p13 }
 0xf1f   : > { %p2899_p5 = pneg %p2898_p9 }
 0xf21   : > { %p2906_p12 = pnand %p2905_p8, %p2899_p5 }
 0xf84   : > { %v1824_v24 = vpop.xlane.xlu0 %1823 }
 0xf85   : > { %v1825_v12 = vsub.f32 %v1818_v9, %v1824_v24 }
 0xf87   : > { %v1826_v13 = vmul.f32 1.442695, %v1825_v12 }
 0xf88   : > { %v2747_v14 = vpop.permute.xlu0 %2746 }
 0xf89   : > { %2778 = vpow2.f32 %v1826_v13  ;;  %v2749_v15 = vunpack.i.h.bf16 %v2747_v14  ;;  %v2748_v17 = vunpack.i.l.bf16 %v2747_v14 }
 0xf8b   : > { %v2507_v18 = vpack.c.bf16 %v2749_v15, %v2748_v17 }
 0xf8c   : > { %v1918_v32 = vpop.permute.xlu0 %1917 }
 0xf8d   : > { %2508 = vmatpush3.bf16.msra.mxu0 %v2507_v18 }
 0xf8e   : > { %2509 = vmatprep.subr.bf16.mxu0 %v3034_v0 }
 0xf90   : > { %v1926_v37 = vpop.permute.xlu0 %1925 }
 0xf93   : > { %v2779_v25 = vpop.eup %2778 }
 0xf94   : > { %v1828_v20 = vsel %vm617_vm4, %v2779_v25, 0.0  ;;  %v1934_v41 = vpop.permute.xlu0 %1933 }
 0xf95   : > { %1829 = vadd.xlane.f32.xlu1 %v1828_v20 }
 0xfa6   : > { %1913 = vrot.lane.b32.xlu1 %v3464_v33, %s3055_s12  ;;  %v1955_v33 = vld [vmem:[#allocation8 + $0x18] sm:$0xff] }
 0xfa7   : > { %v2513_v29 = vpack.c.bf16 %v1955_v33, %v1954_v26 }
 0xfaa   : > { %1921 = vrot.lane.b32.xlu1 %v3483_v57, %s3056_s21 }
 0xfae   : > { %1929 = vrot.lane.b32.xlu1 %v3517_v46, %s3057_s3  ;;  %s3676_s3 = sld [smem:[#allocation24_spill]] }
0x1022   : > { %v1830_v35 = vpop.xlane.xlu1 %1829 }
0x1023   : > { %2780 = vrcp.f32 %v1830_v35 }
0x1026   : > { %v1914_v31 = vpop.permute.xlu1 %1913 }
0x102a   : > { %v1922_v34 = vpop.permute.xlu1 %1921 }
0x102d   : > { %v2781_v19 = vpop.eup %2780 }
0x102e   : > { %v1832_v21 = vmul.f32 %v2781_v19, %v2779_v25 }
0x1030   : > { %2426 = vmatmul.mubr.msk.f32.vlgmr.msra.gmra.mrb[14].mxu0 %vm617_vm4, %v1832_v21 }
0x1031   : > { %2436 = vmatprep.mubr.msk.f32.mxu0 %vm3035_vm0, %v3036_v1  ;;  %2511 = vmatpush3.bf16.msra.mxu0 %v2510_v27  ;;  %v1940_v1 = vsel %vm537_vm2, %v3442_v60, %v1914_v31  ;;  %v2222_v60 = vld [vmem:[%s3675_s15] ss:$0 sm:$0xff] }
0x1032   : > { %2512 = vmatprep.subr.bf16.mxu0 %v3034_v0  ;;  %v1942_v36 = vsel %vm1941_vm5, %v1940_v1, %v1918_v32  ;;  %v1930_v0 = vpop.permute.xlu1 %1929 }
0x1033   : > { %v1944_v38 = vsel %vm1943_vm6, %v1942_v36, %v1922_v34 }
0x1034   : > { %v1945_v39 = vsel %vm617_vm4, %v1944_v38, %v1926_v37 }
0x1035   : > { %2514 = vmatpush3.bf16.msra.mxu0 %v2513_v29  ;;  %v1947_v40 = vsel %vm1946_vm7, %v1945_v39, %v1930_v0 }
0x1036   : > { %v1949_v42 = vsel %vm1948_vm8, %v1947_v40, %v1934_v41 }
0x1103   : > { %v1908_v57 = vpop.f32.mrb[14].mxu0 }
0x1104   : > { %1937 = vrot.lane.b32.xlu1 %v1908_v57, %s3058_s24  ;;  %v2427_v30 = vpop.f32.mrb[15].mxu0  ;;  %s3558_s24 = scalar_lea.hbm %s3676_s3, %s2226_s25 }
0x1176   : > { %v1938_v43 = vpop.permute.xlu1 %1937 }
0x1177   : > { %v1951_v44 = vsel %vm1950_vm9, %v1949_v42, %v1938_v43 }
0x1178   : > { %2437 = vmatmul.mubr.msk.f32.vlgmr.msra.gmra.mrb[16].mxu0 %vm371_vm1, %v1951_v44 }
0x124b   : > { %v2032_v45 = vpop.f32.mrb[16].mxu0 }
0x124c   : > { %v2033_v46 = vadd.f32 %v2222_v60, %v2032_v45  ;;  %v2438_v47 = vpop.f32.mrb[17].mxu0 }
0x124e   : > { %v2036_v48 = vadd.f32 %v2033_v46, %v3381_v16 }
0x1250   : > { %2037 = vst.msk [vmem:[%s354_s8] sm:$0xff] %vm371_vm1, %v2036_v48 }
0x1251   : > { %2909 = shalt.err (!%p2906_p12)
}
0x1252   : > { %s2910_s13 = scalar_lea.hbm %s3558_s24, 128  ;;  %s2914_s19 = scalar_lea.hbm %s3676_s3, 512 }
0x1253   : > { %p2911_p4 = scmp.ne.s32.totalorder %s3558_s24, %s2910_s13  ;;  %p2915_p0 = scmp.lt.u32.totalorder %s3558_s24, %s3676_s3 }
0x1254   : > { %p2916_p1 = scmp.lt.u32.totalorder %s2914_s19, %s2910_s13  ;;  %p2918_p10 = scmp.lt.u32.totalorder %s2910_s13, %s3558_s24 }
0x1255   : > { %p2912_p7 = pnand %p2911_p4, %p3677_p2 }
0x1256   : > { %p2917_p11 = por %p2916_p1, %p2915_p0 }
0x1257   : > { %p2913_p3 = pneg %p2912_p7 }
0x1258   : > { %p2919_p9 = por %p2918_p10, %p2917_p11 }
0x125a   : > { %p2920_p5 = pnand %p2919_p9, %p2913_p3 }
0x125c   : > { %2923 = shalt.err (!%p2920_p5)
}
0x125d   : > { %2529 = dma.vmem_to_hbm [thread:$0]  (%p3677_p2), %s3560_s17, 128, %s3558_s24, %s2039_s30  }
0x125e PF: > { %s3678_s8 = sld [smem:[#allocation15_spill]]  ;;  %s3679_s12 = sld [smem:[#allocation19_spill]] }
0x125f   : > { %p2556_p13 = scmp.ge.s32.totalorder %s3026_s11, 2 }
0x1264   : > { %s2066_s21 = sand.u32 1, %s3678_s8   ;;  %p3680_p6 = scmp.ne.s32.totalorder %s3679_s12, 0 }
0x1265   : > { %s2067_s1 = scalar_lea.sflag [#allocation4], %s2066_s21 }
0x1266   : > { %p2546_p8 = pnand %p2556_p13, %p3680_p6 }
0x1268   : > { %2981 = dma.done.wait (!%p2546_p8), %s2067_s1, 128  }
0x1269   : > { %2983 = vsyncadd (!%p2546_p8), %s2067_s1, 4294967168  ;;  %s25_s11 = sadd.s32 1, %s3026_s11   ;;  %s3681_s24 = sld [smem:[#allocation16_spill]] }
0x126a   : > { %p22_p12 = scmp.ge.s32.totalorder %s25_s11, 6   ;;  %s3682_s25 = smov %s2994_s26 }
0x126b   : > { %s3683_s26 = smov %s3307_s27  ;;  %s3684_s27 = smov %s3002_s28 }
0x126c   : > { %s3685_s28 = smov %s3006_s29  ;;  %s3686_s29 = smov %s3302_s7 }
0x126d   : > { %s3687_s30 = smov %s3018_s9  ;;  %s3688_s8 = smov %s3022_s10 }
0x126e   : > { %s3689_s9 = smov %s3692_s6  ;;  %s3690_s10 = smov %s3696_s22 }
0x126f   :  { %24 = sbr.rel (!%p22_p12) target bundleno = 17 (0x11), region = 106 }
0x1276   :  { %2072 = vsyncpa [#allocation3], 1 }
0x1277   :  { %2074 = vsyncpa [#allocation3 + $0x1], 1 }
0x1278   :  { %2075 = vsyncpa [#allocation6], 1 }
0x1279   :  { %2076 = vsyncpa [#allocation9], 1 }
0x127a   :  { %2077 = vsyncpa [#allocation4], 1 }
0x127b   :  { %2079 = vsyncpa [#allocation4 + $0x1], 1 }

// kernel: tpu_custom_call.1
= control target key start
LH: loop header
LB: loop body
LE: loop exit
PB: predicated region body
PF: predicated region fallthrough
CT: control target
= control target key end

     0   :  { %s3621_s0 = inlined_call_operand.hbm [shape: f32[2,16,32], index: 0, kind: input, shape index: {}]   ;;  %s3622_s1 = inlined_call_operand.hbm [shape: f32[32,32], index: 1, kind: input, shape index: {}]   ;;  %s3623_s2 = inlined_call_operand.hbm [shape: f32[32,64], index: 2, kind: input, shape index: {}]   ;;  %s3624_s3 = inlined_call_operand.vmem [shape: f32[1,32], index: 3, kind: input, shape index: {}]   ;;  %s3625_s4 = inlined_call_operand.vmem [shape: f32[1,64], index: 4, kind: input, shape index: {}]   ;;  %s3626_s5 = inlined_call_operand.hbm [shape: f32[32,32], index: 5, kind: input, shape index: {}]   ;;  %s3627_s6 = inlined_call_operand.vmem [shape: f32[1,32], index: 6, kind: input, shape index: {}]   ;;  %s3628_s7 = inlined_call_operand.hbm [shape: f32[2,16,32], index: 7, kind: output, shape index: {}]  }
   0x1   :  { %3642 = sst [smem:[#allocation20_spill]] %s3622_s1 }
   0x2   :  { %3643 = sst [smem:[#allocation21_spill]] %s3623_s2 }
   0x3   :  { %3644 = sst [smem:[#allocation22_spill]] %s3624_s3 }
   0x4   :  { %3645 = sst [smem:[#allocation23_spill]] %s3627_s6 }
   0x5   :  { %3646 = sst [smem:[#allocation24_spill]] %s3628_s7 }
   0x6   :  { %12 = vsyncpa [#allocation3], 0 }
   0x7   :  { %14 = vsyncpa [#allocation3 + $0x1], 0 }
   0x8   :  { %15 = vsyncpa [#allocation6], 0 }
   0x9   :  { %16 = vsyncpa [#allocation9], 0 }
   0xa   :  { %17 = vsyncpa [#allocation4], 0 }
   0xb   :  { %19 = vsyncpa [#allocation4 + $0x1], 0  ;;  %s3100_s24 = smov 0   ;;  %s3102_s25 = smov 0  }
   0xc   :  { %s3104_s26 = smov 0   ;;  %s3106_s27 = smov 0  }
   0xd   :  { %s3108_s28 = smov 0   ;;  %s3110_s29 = smov 0  }
   0xe   :  { %s3112_s30 = smov 0   ;;  %s3114_s8 = smov 0  }
   0xf   :  { %s3116_s9 = smov 0   ;;  %s3118_s10 = smov 0  }
  0x10   :  { %s3120_s11 = smov 0  }
  0x11 LB: > { %3647 = sst [smem:[#allocation15_spill]] %s2986_s24  ;;  %s2168_s12 = sadd.s32 4294967295, %s3026_s11   ;;  %s3026_s11 = sphi %s3120_s11, %s25_s11   ;;  %s3022_s10 = sphi %s3118_s10, %s3690_s10   ;;  %s3018_s9 = sphi %s3116_s9, %s3689_s9   ;;  %s3014_s8 = sphi %s3114_s8, %s3688_s8   ;;  %s3010_s30 = sphi %s3112_s30, %s3687_s30   ;;  %s3006_s29 = sphi %s3110_s29, %s3686_s29   ;;  %s3002_s28 = sphi %s3108_s28, %s3685_s28   ;;  %s2998_s27 = sphi %s3106_s27, %s3684_s27   ;;  %s2994_s26 = sphi %s3104_s26, %s3683_s26   ;;  %s2990_s25 = sphi %s3102_s25, %s3682_s25   ;;  %s2986_s24 = sphi %s3100_s24, %s3681_s24  }
  0x12   : > { %3648 = sst [smem:[#allocation16_spill]] %s2990_s25  ;;  %s2169_s13 = sadd.s32 4294967294, %s3026_s11  }
  0x13   : > { %3649 = sst [smem:[#allocation17_spill]] %s3014_s8  ;;  %p57_p0 = scmp.ne.s32.totalorder %s3002_s28, %s2998_s27 }
  0x14   : > { %p3156_p1 = scmp.eq.s32.totalorder %s2168_s12, 0  ;;  %p208_p2 = scmp.ne.s32.totalorder %s2994_s26, %s2990_s25 }
  0x15   : > { %p209_p4 = scmp.eq.s32.totalorder %s2168_s12, 3  ;;  %p214_p5 = scmp.ne.s32.totalorder %s2990_s25, %s2986_s24 }
  0x16   : > { %s3650_s14 = scalar_select %p3156_p1, 1, 0 }
  0x17   : > { %p3165_p3 = por %p3156_p1, %p57_p0  ;;  %p215_p6 = scmp.eq.s32.totalorder %s2169_s13, 3 }
  0x18   : > { %p3171_p7 = por %p209_p4, %p208_p2  ;;  %p2170_p8 = scmp.ge.s32.totalorder %s3026_s11, 1 }
  0x19   : > { %s3651_s16 = scalar_select %p3165_p3, 1, 0 }
  0x1a   : > { %s3652_s17 = scalar_select %p3171_p7, 1, 0 }
  0x1b   : > { %p3176_p9 = por %p215_p6, %p214_p5  ;;  %p222_p10 = scmp.lt.s32.totalorder %s3026_s11, 5 }
  0x1c   : > { %3653 = sst [smem:[#allocation18_spill]] %s3652_s17  ;;  %s3028_s20 = smov [#allocation5]  }
  0x1d   : > { %s3654_s18 = scalar_select %p3176_p9, 1, 0 }
  0x1e   : > { %p3181_p11 = pnand %p2170_p8, %p222_p10  ;;  %s234_s21 = sshll.u32 %s3028_s20, 4  ;;  %s3185_s21 = int_to_ptr.vmem [resolvable:$true] %s234_s21 }
  0x1f   : > { %3655 = sst [smem:[#allocation19_spill]] %s3654_s18  ;;  %s3029_s23 = smov [#allocation7]  }
  0x20   : > { %s3656_s19 = scalar_select %p3181_p11, 1, 0 }
  0x21   : > { %p2531_p12 = pneg %p3181_p11  ;;  %s247_s27 = sshll.u32 %s3029_s23, 4  ;;  %s3195_s27 = int_to_ptr.vmem [resolvable:$true] %s247_s27 }
  0x22   : > { %s3030_s12 = smov [#allocation8]   ;;  %s3658_s1 = sld [smem:[#allocation20_spill]] }
  0x23   : > { %p3191_p13 = pnand %p2531_p12, %p3156_p1  ;;  %s3197_s13 = sshll.u32 %s3030_s12, 4  ;;  %s267_s13 = int_to_ptr.vmem [resolvable:$true] %s3197_s13 }
  0x25   : > { %p3207_p2 = pneg %p3191_p13 }
  0x28   : > { %s2782_s20 = scalar_lea.hbm %s3658_s1, 512 }
  0x29   : > { %p2783_p0 = scmp.ne.s32.totalorder %s3658_s1, %s2782_s20  ;;  %p2789_p6 = scmp.lt.u32.totalorder %s2782_s20, %s3658_s1 }
  0x2b   : > { %p2785_p4 = pnand %p3207_p2, %p2783_p0 }
  0x2d   : > { %p2786_p5 = pneg %p2785_p4 }
  0x2f   : > { %p2791_p8 = pnand %p2789_p6, %p2786_p5 }
  0x31   : > { %2794 = shalt.err (!%p2791_p8)
}
  0x32   : > { %s2795_s7 = scalar_lea.vmem %s3185_s21, 512  ;;  %p2803_p7 = scmp.lt.s32.totalorder %s3185_s21, %s3185_s21 }
  0x33   : > { %p2796_p10 = scmp.ne.s32.totalorder %s3185_s21, %s2795_s7  ;;  %p2804_p1 = scmp.lt.s32.totalorder %s2795_s7, %s2795_s7 }
  0x35   : > { %p2798_p12 = pnand %p2796_p10, %p3207_p2  ;;  %p2805_p0 = por %p2804_p1, %p2803_p7 }
  0x37   : > { %p2799_p9 = pneg %p2798_p12 }
  0x39   : > { %p2806_p4 = pnand %p2805_p0, %p2799_p9 }
  0x3b   : > { %2809 = shalt.err (!%p2806_p4)
}
  0x3c   : > { %s3640_s24 = smov 128   ;;  %s3641_s15 = smov 8  }
  0x3d   : > { %2534 = dma.hbm_to_vmem [thread:$0]  (!%p3191_p13), %s3658_s1, 512, %s3185_s21, [#allocation6], %s3640_s24, %s3640_s24, %s3641_s15  }
  0x3e   : > { %s3660_s2 = sld [smem:[#allocation21_spill]] }
  0x44   : > { %s2810_s7 = scalar_lea.hbm %s3660_s2, 512 }
  0x45   : > { %p2811_p1 = scmp.ne.s32.totalorder %s3660_s2, %s2810_s7  ;;  %p2817_p5 = scmp.lt.u32.totalorder %s2810_s7, %s3660_s2 }
  0x47   : > { %p2813_p7 = pnand %p2811_p1, %p3207_p2 }
  0x49   : > { %p2814_p9 = pneg %p2813_p7 }
  0x4b   : > { %p2819_p6 = pnand %p2817_p5, %p2814_p9 }
  0x4d   : > { %2822 = shalt.err (!%p2819_p6)
}
  0x4e   : > { %s2823_s21 = scalar_lea.vmem %s3195_s27, 512  ;;  %p2831_p0 = scmp.lt.s32.totalorder %s3195_s27, %s3195_s27 }
  0x4f   : > { %p2824_p8 = scmp.ne.s32.totalorder %s3195_s27, %s2823_s21  ;;  %p2832_p4 = scmp.lt.s32.totalorder %s2823_s21, %s2823_s21 }
  0x51   : > { %p2826_p10 = pnand %p2824_p8, %p3207_p2  ;;  %p2833_p1 = por %p2832_p4, %p2831_p0 }
  0x53   : > { %p2827_p12 = pneg %p2826_p10 }
  0x55   : > { %p2834_p7 = pnand %p2833_p1, %p2827_p12 }
  0x57   : > { %2837 = shalt.err (!%p2834_p7)
}
  0x58   : > { %2537 = dma.hbm_to_vmem [thread:$0]  (!%p3191_p13), %s3660_s2, 512, %s3195_s27, [#allocation6], %s3640_s24, %s3640_s24, %s3641_s15  }
  0x59   : > { %s2838_s18 = scalar_lea.hbm %s3626_s5, 512 }
  0x5a   : > { %p2839_p9 = scmp.ne.s32.totalorder %s3626_s5, %s2838_s18  ;;  %p2845_p8 = scmp.lt.u32.totalorder %s2838_s18, %s3626_s5 }
  0x5c   : > { %p2841_p5 = pnand %p2839_p9, %p3207_p2 }
  0x5e   : > { %p2842_p6 = pneg %p2841_p5 }
  0x60   : > { %p2847_p10 = pnand %p2845_p8, %p2842_p6 }
  0x62   : > { %2850 = shalt.err (!%p2847_p10)
}
  0x63   : > { %s2851_s21 = scalar_lea.vmem %s267_s13, 512  ;;  %p2859_p1 = scmp.lt.s32.totalorder %s267_s13, %s267_s13 }
  0x64   : > { %p2852_p12 = scmp.ne.s32.totalorder %s267_s13, %s2851_s21  ;;  %p2860_p7 = scmp.lt.s32.totalorder %s2851_s21, %s2851_s21 }
  0x66   : > { %p2854_p0 = pnand %p2852_p12, %p3207_p2  ;;  %p2861_p3 = por %p2860_p7, %p2859_p1 }
  0x68   : > { %p2855_p4 = pneg %p2854_p0 }
  0x6a   : > { %p2862_p11 = pnand %p2861_p3, %p2855_p4 }
  0x6c   : > { %2865 = shalt.err (!%p2862_p11)
}
  0x6d   : > { %2540 = dma.hbm_to_vmem [thread:$0]  (!%p3191_p13), %s3626_s5, 512, %s267_s13, [#allocation9], %s3640_s24, %s3640_s24, %s3641_s15  }
  0x6e   : > { %s34_s6 = sadd.s32 1, %s3018_s9  ;;  %s37_s22 = sadd.s32 1, %s3022_s10 }
  0x6f   : > { %p35_p3 = scmp.ge.s32.totalorder %s34_s6, 2  ;;  %s44_s25 = sadd.s32 1, %s3006_s29 }
  0x70   : > { %p51_p11 = scmp.ne.s32.totalorder %s3006_s29, %s3002_s28  ;;  %p52_p2 = scmp.eq.s32.totalorder %s3026_s11, 0 }
  0x71   : > { %s3692_s6 = smov (%p35_p3, %s34_s6), 0  ;;  %s3694_s22 = smov (!%p35_p3, %s37_s22), %s3022_s10 }
  0x72   : > { %s194_s8 = ssub.s32 %s3018_s9, %s3692_s6  ;;  %p39_p9 = scmp.ge.s32.totalorder %s3694_s22, 2 }
  0x73   : > { %p2552_p5 = scmp.lt.s32.totalorder %s3026_s11, 4  ;;  %p3291_p13 = por %p52_p2, %p51_p11 }
  0x74   : > { %s283_s17 = sand.u32 1, %s3006_s29   ;;  %s3696_s22 = smov (%p39_p9, %s3694_s22), 0 }
  0x75   : > { %s2175_s18 = sshll.u32 %s283_s17, 4  ;;  %s41_s20 = ssub.s32 %s3022_s10, %s3696_s22 }
  0x76   : > { %p42_p6 = scmp.eq.s32.totalorder %s41_s20, 0  ;;  %s195_s23 = sor.u32 %s194_s8, %s41_s20 }
  0x77   : > { %p196_p8 = scmp.eq.s32.totalorder %s195_s23, 0  ;;  %s2229_s12 = sshll.u32 %s3022_s10, 8 }
  0x78   : > { %s3302_s7 = scalar_select %p42_p6, %s3006_s29, %s44_s25  }
  0x79   : > { %s3662_s21 = sadd.s32 1, %s2994_s26  ;;  %s3312_s15 = scalar_lea.hbm %s3621_s0, %s2229_s12 }
  0x7a   : > { %s3307_s27 = scalar_select %p196_p8, %s2994_s26, %s3662_s21  }
  0x7b   : > { %s287_s1 = scalar_lea.vmem [#allocation2], %s2175_s18  ;;  %p3320_p10 = pnand %p2552_p5, %p3291_p13 }
  0x7c   : > { %s294_s2 = sshll.u32 %s287_s1, 4  ;;  %s3324_s8 = scalar_lea.sflag [#allocation3], %s283_s17  ;;  %s3314_s2 = int_to_ptr.vmem [resolvable:$true] %s294_s2 }
  0x7d   : > { %s2866_s24 = scalar_lea.hbm %s3312_s15, 256  ;;  %p2868_p0 = pneg %p3320_p10 }
  0x7e   : > { %p2867_p12 = scmp.ne.s32.totalorder %s3312_s15, %s2866_s24  ;;  %s2871_s13 = scalar_lea.hbm %s3621_s0, 512 }
  0x7f   : > { %p2872_p7 = scmp.lt.u32.totalorder %s3312_s15, %s3621_s0  ;;  %p2873_p3 = scmp.lt.u32.totalorder %s2871_s13, %s2866_s24 }
  0x80   : > { %p2869_p4 = pnand %p2868_p0, %p2867_p12  ;;  %p2875_p2 = scmp.lt.u32.totalorder %s2866_s24, %s3312_s15 }
  0x81   : > { %p2874_p11 = por %p2873_p3, %p2872_p7 }
  0x82   : > { %p2870_p1 = pneg %p2869_p4 }
  0x83   : > { %p2876_p9 = por %p2875_p2, %p2874_p11 }
  0x85   : > { %p2877_p5 = pnand %p2876_p9, %p2870_p1 }
  0x87   : > { %2880 = shalt.err (!%p2877_p5)
}
  0x88   : > { %s2881_s17 = scalar_lea.vmem %s3314_s2, 256  ;;  %s3033_s12 = smov [#allocation2]  }
  0x89   : > { %p2882_p13 = scmp.ne.s32.totalorder %s3314_s2, %s2881_s17  ;;  %s2886_s21 = sshll.u32 %s3033_s12, 4  ;;  %s2887_s21 = int_to_ptr.vmem [resolvable:$false] %s2886_s21 }
  0x8a   : > { %s2888_s3 = scalar_lea.vmem %s2887_s21, 512  ;;  %p2889_p12 = scmp.lt.s32.totalorder %s3314_s2, %s2887_s21 }
  0x8b   : > { %p2884_p6 = pnand %p2882_p13, %p2868_p0  ;;  %p2890_p4 = scmp.lt.s32.totalorder %s2888_s3, %s2881_s17 }
  0x8d   : > { %p2885_p8 = pneg %p2884_p6  ;;  %p2891_p7 = por %p2890_p4, %p2889_p12 }
  0x8f   : > { %p2892_p3 = pnand %p2891_p7, %p2885_p8 }
  0x91   : > { %2895 = shalt.err (!%p2892_p3)
}
  0x92   : > { %s3664_s24 = smov 8   ;;  %s3665_s1 = smov 128  }
  0x93   : > { %2544 = dma.hbm_to_vmem [thread:$0]  (!%p3320_p10), %s3312_s15, 256, %s3314_s2, %s3324_s8, %s3665_s1, %s3665_s1, %s3664_s24  }
  0x94   : > { %p3666_p0 = scmp.ne.s32.totalorder %s3656_s19, 0 }
  0x95   : > { %s308_s18 = sand.u32 (!%p3666_p0), 1, %s3002_s28   ;;  %p3667_p1 = scmp.ne.s32.totalorder (!%p3666_p0), %s3651_s16, 0 }
  0x96   : > { %306 = sbr.rel (%p3666_p0) target bundleno = 4702 (0x125e), region = 48  ;;  %s2179_s13 = sshll.u32 (!%p3666_p0), %s308_s18, 4 }
  0x97   : > { %s309_s20 = scalar_lea.sflag (!%p3666_p0), [#allocation3], %s308_s18  ;;  %s3358_s23 = scalar_lea.vmem (!%p3666_p0), [#allocation2], %s2179_s13 }
  0x9d   : > { %2969 = dma.done.wait (%p3667_p1), %s309_s20, 256  }
  0x9e   : > { %2971 = vsyncadd (%p3667_p1), %s309_s20, 4294967040  ;;  %p3668_p11 = scmp.ne.s32.totalorder %s3650_s14, 0 }
  0xa0   : > { %2973 = dma.done.wait (%p3668_p11), [#allocation6], 1024  }
  0xa1   : > { %2975 = vsyncadd (%p3668_p11), [#allocation6], 4294966272 }
  0xa2   : > { %2977 = dma.done.wait (%p3668_p11), [#allocation9], 512  }
  0xa3   : > { %2979 = vsyncadd (%p3668_p11), [#allocation9], 4294966784  ;;  %v3034_v0 = vmov 0.0|0.0   ;;  %vm3035_vm0 = vmmov 0   ;;  %v3036_v1 = vmov 0.0   ;;  %vm371_vm1 = vcmask 261120  }
  0xa4   : > { %2439 = vmatprep.subr.bf16.mxu0 %v3034_v0  ;;  %2302 = vmatprep.mubr.msk.f32.mxu0 %vm3035_vm0, %v3036_v1  ;;  %v445_v2 = vld [vmem:[#allocation7] sm:$0xff]  ;;  %v446_v3 = vld [vmem:[#allocation7 + $0x8] sm:$0xff]  ;;  %v447_v4 = vld [vmem:[#allocation7 + $0x10] sm:$0xff]  ;;  %s2184_s2 = sshll.u32 %s3010_s30, 3  ;;  %vm537_vm2 = vcmask 31744   ;;  %s3037_s15 = smov 96  }
  0xa5   : > { %v2445_v5 = vpack.c.bf16 %v446_v3, %v445_v2  ;;  %v448_v6 = vld [vmem:[#allocation7 + $0x18] sm:$0xff]  ;;  %v356_v7 = vld [vmem:[%s3358_s23] sm:$0xff]  ;;  %v361_v10 = vld [vmem:[#allocation5 + $0x8] sm:$0xff]  ;;  %s358_s14 = scalar_lea.vmem %s3358_s23, %s2184_s2 [#allocation2]  ;;  %s3671_s17 = sld [smem:[#allocation22_spill]]  ;;  %vm617_vm4 = vcmask 130048   ;;  %vm1941_vm5 = vcmask 64512  }
  0xa6   : > { %v2449_v8 = vpack.c.bf16 %v448_v6, %v447_v4  ;;  %2313 = vmatprep.mubr.msk.f32.mxu1 %vm371_vm1, %v356_v7  ;;  %v360_v9 = vld [vmem:[#allocation5] sm:$0xff]  ;;  %v362_v11 = vld [vmem:[#allocation5 + $0x10] sm:$0xff]  ;;  %v363_v13 = vld [vmem:[#allocation5 + $0x18] sm:$0xff]  ;;  %s3038_s12 = smov 124   ;;  %s3039_s21 = smov 120   ;;  %vm1943_vm6 = vcmask 97280  }
  0xa7   : > { %2446 = vmatprep.subr.bf16.mxu1 %v2445_v5  ;;  %v2440_v12 = vpack.c.bf16 %v361_v10, %v360_v9  ;;  %v2443_v14 = vpack.c.bf16 %v363_v13, %v362_v11  ;;  %v357_v15 = vld [vmem:[%s3358_s23 + $0x8] sm:$0xff]  ;;  %v3381_v16 = vld [vmem:[%s358_s14] sm:$0xff]  ;;  %vm3397_vm3 = vmpackc.low %vm537_vm2, %vm537_vm2  ;;  %s3040_s3 = smov 88   ;;  %s3041_s24 = smov 92   ;;  %vm1946_vm7 = vcmask 162816   ;;  %vm1948_vm8 = vcmask 195584  }
  0xa8   : > { %2448 = vmatpush3.bf16.msra.mxu1 %v2445_v5  ;;  %v2187_v17 = vld [vmem:[%s3625_s4] ss:$0 sm:$0xff]  ;;  %s3042_s1 = smov 116   ;;  %s3043_s18 = smov 84   ;;  %vm1950_vm9 = vcmask 228352  }
  0xa9   : > { %2450 = vmatprep.subr.bf16.mxu1 %v2449_v8  ;;  %2441 = vmatpush3.bf16.msra.mxu0 %v2440_v12  ;;  %s3044_s13 = smov 112   ;;  %s3045_s20 = smov 108  }
  0xaa   : > { %2442 = vmatprep.subr.bf16.mxu0 %v3034_v0  ;;  %s3046_s23 = smov 80   ;;  %s3047_s2 = smov 76  }
  0xab   : > { %v2185_v27 = vld [vmem:[%s3671_s17] ss:$0 sm:$0xff]  ;;  %s3048_s14 = smov 104   ;;  %s3049_s16 = smov 100  }
  0xac   : > { %2452 = vmatpush3.bf16.msra.mxu1 %v2449_v8  ;;  %s3050_s19 = smov 72   ;;  %s3052_s25 = smov 8  }
  0xad   : > { %2444 = vmatpush3.bf16.msra.mxu0 %v2443_v14  ;;  %2457 = vmatprep.subr.bf16.mxu1 %v3034_v0  ;;  %s3053_s8 = smov 16   ;;  %s3054_s17 = smov 24  }
  0xae   : > { %2453 = vmatprep.subr.bf16.mxu0 %v3034_v0 }
  0xaf   : > { %2314 = vmatmul.mubr.msk.f32.vlgmr.msra.gmra.mrb[0].mxu1 %vm371_vm1, %v357_v15 }
  0xb0   : > { %2303 = vmatmul.mubr.msk.f32.vlgmr.msra.gmra.mrb[0].mxu0 %vm371_vm1, %v3381_v16  ;;  %2327 = vmatprep.mubr.msk.f32.mxu1 %vm3035_vm0, %v3036_v1 }
  0xb1   : > { %2320 = vmatprep.mubr.msk.f32.mxu0 %vm3035_vm0, %v3036_v1 }
 0x182   : > { %v2315_v18 = vpop.f32.mrb[0].mxu1 }
 0x183   : > { %v534_v19 = vadd.f32 %v2315_v18, %v2187_v17  ;;  %v528_v20 = vpop.f32.mrb[1].mxu1  ;;  %v441_v21 = vpop.f32.mrb[0].mxu0 }
 0x184   : > { %v529_v22 = vadd.f32 %v2187_v17, %v528_v20  ;;  %v2304_v23 = vpop.f32.mrb[1].mxu0  ;;  %v3410_v28 = vadd.f32 %v2185_v27, %v441_v21 }
 0x186   : > { %v3401_v25 = vpack.i.bf16 %v534_v19, %v529_v22  ;;  %v2454_v26 = vpack.c.bf16 %v534_v19, %v529_v22 }
 0x188   : > { %2676 = vrot.lane.b32.xlu1 %v3401_v25, %s3037_s15  ;;  %2456 = vmatpush3.bf16.xpose.msk.msra.mxu0 %vm3397_vm3, %v2454_v26  ;;  %s3051_s15 = smov 68  }
 0x189   : > { %2467 = vmatprep.subr.bf16.mxu0 %v3034_v0 }
 0x18c   : > { %2681 = vrot.lane.b32.xlu1 %v3401_v25, %s3038_s12 }
 0x18f   : > { %2321 = vmatmul.mubr.msk.f32.vlgmr.msra.gmra.mrb[2].mxu0 %vm537_vm2, %v3410_v28 }
 0x190   : > { %2686 = vrot.lane.b32.xlu1 %v3401_v25, %s3039_s21  ;;  %2348 = vmatprep.mubr.msk.f32.mxu0 %vm3035_vm0, %v3036_v1 }
 0x194   : > { %880 = vrot.lane.b32.xlu1 %v3410_v28, %s3039_s21  ;;  %s3056_s21 = smov 12  }
 0x1fa   : > { %v2677_v29 = vpop.permute.xlu1 %2676 }
 0x1fb   : > { %v2679_v30 = vunpack.i.h.bf16 %v2677_v29  ;;  %v2678_v31 = vunpack.i.l.bf16 %v2677_v29 }
 0x1fd   : > { %v2458_v32 = vpack.c.bf16 %v2679_v30, %v2678_v31 }
 0x1fe   : > { %v2682_v33 = vpop.permute.xlu1 %2681 }
 0x1ff   : > { %2459 = vmatpush3.bf16.msra.mxu1 %v2458_v32  ;;  %v2684_v51 = vunpack.i.h.bf16 %v2682_v33  ;;  %v2683_v52 = vunpack.i.l.bf16 %v2682_v33 }
 0x200   : > { %2460 = vmatprep.subr.bf16.mxu1 %v3034_v0 }
 0x201   : > { %v2461_v55 = vpack.c.bf16 %v2684_v51, %v2683_v52 }
 0x202   : > { %v2687_v34 = vpop.permute.xlu1 %2686 }
 0x203   : > { %v2689_v35 = vunpack.i.h.bf16 %v2687_v34  ;;  %v2688_v36 = vunpack.i.l.bf16 %v2687_v34 }
 0x205   : > { %v2468_v37 = vpack.c.bf16 %v2689_v35, %v2688_v36 }
 0x206   : > { %v881_v38 = vpop.permute.xlu1 %880 }
 0x207   : > { %2470 = vmatpush3.bf16.xpose.msk.msra.mxu0 %vm3397_vm3, %v2468_v37 }
 0x208   : > { %2478 = vmatprep.subr.bf16.mxu0 %v3034_v0 }
 0x20e   : > { %2349 = vmatmul.mubr.msk.f32.vlgmr.msra.gmra.mrb[4].mxu0 %vm537_vm2, %v881_v38 }
 0x20f   : > { %2369 = vmatprep.mubr.msk.f32.mxu0 %vm3035_vm0, %v3036_v1 }
 0x262   : > { %v613_v39 = vpop.f32.mrb[2].mxu0 }
 0x263   : > { %v2322_v40 = vpop.f32.mrb[3].mxu0  ;;  %v618_v41 = vsel %vm617_vm4, %v613_v39, -inf }
 0x264   : > { %619 = vmax.xlane.f32.xlu0 %v618_v41 }
 0x2e1   : > { %v958_v42 = vpop.f32.mrb[4].mxu0 }
 0x2e2   : > { %v2350_v43 = vpop.f32.mrb[5].mxu0  ;;  %v962_v49 = vsel %vm617_vm4, %v958_v42, -inf }
 0x2f1   : > { %v620_v44 = vpop.xlane.xlu0 %619 }
 0x2f2   : > { %v621_v45 = vsub.f32 %v613_v39, %v620_v44 }
 0x2f4   : > { %v622_v46 = vmul.f32 1.442695, %v621_v45 }
 0x2f6   : > { %2750 = vpow2.f32 %v622_v46 }
 0x300   : > { %v2751_v47 = vpop.eup %2750 }
 0x301   : > { %v624_v48 = vsel %vm617_vm4, %v2751_v47, 0.0 }
 0x302   : > { %625 = vadd.xlane.f32.xlu0 %v624_v48 }
 0x318   : > { %708 = vrot.lane.b32.xlu0 %v3410_v28, %s3038_s12  ;;  %s3055_s12 = smov 4  }
 0x337   : > { %963 = vmax.xlane.f32.xlu0 %v962_v49 }
 0x34d   : > { %2696 = vrot.lane.b32.xlu0 %v3401_v25, %s3040_s3  ;;  %s3057_s3 = smov 20  }
 0x38f   : > { %v626_v50 = vpop.xlane.xlu0 %625 }
 0x390   : > { %2752 = vrcp.f32 %v626_v50 }
 0x393   : > { %v709_v56 = vpop.permute.xlu0 %708 }
 0x39a   : > { %v2753_v53 = vpop.eup %2752 }
 0x39b   : > { %v628_v54 = vmul.f32 %v2753_v53, %v2751_v47 }
 0x39d   : > { %2328 = vmatmul.mubr.msk.f32.vlgmr.msra.gmra.mrb[2].mxu1 %vm617_vm4, %v628_v54 }
 0x39e   : > { %2463 = vmatpush3.bf16.xpose.msk.msra.mxu1 %vm3397_vm3, %v2461_v55  ;;  %2334 = vmatprep.mubr.msk.f32.mxu1 %vm3035_vm0, %v3036_v1 }
 0x39f   : > { %2464 = vmatprep.subr.bf16.mxu1 %v3034_v0 }
 0x3a5   : > { %2335 = vmatmul.mubr.msk.f32.vlgmr.msra.gmra.mrb[4].mxu1 %vm537_vm2, %v709_v56 }
 0x3a6   : > { %2341 = vmatprep.mubr.msk.f32.mxu1 %vm3035_vm0, %v3036_v1 }
 0x3c4   : > { %v964_v57 = vpop.xlane.xlu0 %963 }
 0x3c5   : > { %v965_v58 = vsub.f32 %v958_v42, %v964_v57 }
 0x3c7   : > { %v966_v59 = vmul.f32 1.442695, %v965_v58 }
 0x3c8   : > { %v2697_v17 = vpop.permute.xlu0 %2696 }
 0x3c9   : > { %2754 = vpow2.f32 %v966_v59  ;;  %v2699_v18 = vunpack.i.h.bf16 %v2697_v17  ;;  %v2698_v19 = vunpack.i.l.bf16 %v2697_v17 }
 0x3cb   : > { %v2472_v23 = vpack.c.bf16 %v2699_v18, %v2698_v19 }
 0x3d3   : > { %v2755_v3 = vpop.eup %2754 }
 0x3d4   : > { %v968_v4 = vsel %vm617_vm4, %v2755_v3, 0.0 }
 0x470   : > { %v3442_v60 = vpop.f32.mrb[2].mxu1 }
 0x471   : > { %v2329_v61 = vpop.f32.mrb[3].mxu1 }
 0x478   : > { %v786_v62 = vpop.f32.mrb[4].mxu1 }
 0x479   : > { %v2336_v63 = vpop.f32.mrb[5].mxu1  ;;  %v790_v2 = vsel %vm617_vm4, %v786_v62, -inf }
 0x47a   : > { %791 = vmax.xlane.f32.xlu1 %v790_v2 }
 0x47e   : > { %969 = vadd.xlane.f32.xlu1 %v968_v4 }
 0x48f   : > { %2691 = vrot.lane.b32.xlu1 %v3401_v25, %s3041_s24  ;;  %s3058_s24 = smov 28  }
 0x507   : > { %v792_v5 = vpop.xlane.xlu1 %791 }
 0x508   : > { %v793_v6 = vsub.f32 %v786_v62, %v792_v5 }
 0x50a   : > { %v794_v7 = vmul.f32 1.442695, %v793_v6 }
 0x50b   : > { %v970_v8 = vpop.xlane.xlu1 %969 }
 0x50c   : > { %2756 = vpow2.f32 %v794_v7 }
 0x50f   : > { %v2692_v9 = vpop.permute.xlu1 %2691 }
 0x510   : > { %v2694_v10 = vunpack.i.h.bf16 %v2692_v9  ;;  %v2693_v11 = vunpack.i.l.bf16 %v2692_v9 }
 0x512   : > { %v2465_v12 = vpack.c.bf16 %v2694_v10, %v2693_v11 }
 0x514   : > { %2466 = vmatpush3.bf16.msra.mxu1 %v2465_v12 }
 0x515   : > { %2471 = vmatprep.subr.bf16.mxu1 %v3034_v0 }
 0x516   : > { %v2757_v13 = vpop.eup %2756 }
 0x517   : > { %v796_v14 = vsel %vm617_vm4, %v2757_v13, 0.0 }
 0x518   : > { %797 = vadd.xlane.f32.xlu1 %v796_v14 }
 0x529   : > { %2701 = vrot.lane.b32.xlu1 %v3401_v25, %s3042_s1 }
 0x52d   : > { %1052 = vrot.lane.b32.xlu1 %v3410_v28, %s3042_s1  ;;  %s3672_s1 = sld [smem:[#allocation16_spill]] }
 0x5a5   : > { %v798_v15 = vpop.xlane.xlu1 %797 }
 0x5a6   : > { %2758 = vrcp.f32 %v798_v15 }
 0x5a7   : > { %2760 = vrcp.f32 %v970_v8 }
 0x5a9   : > { %v2702_v26 = vpop.permute.xlu1 %2701 }
 0x5aa   : > { %v2704_v29 = vunpack.i.h.bf16 %v2702_v26  ;;  %v2703_v30 = vunpack.i.l.bf16 %v2702_v26 }
 0x5ac   : > { %v2475_v31 = vpack.c.bf16 %v2704_v29, %v2703_v30 }
 0x5ad   : > { %v1053_v32 = vpop.permute.xlu1 %1052 }
 0x5b0   : > { %v2759_v20 = vpop.eup %2758 }
 0x5b1   : > { %v800_v21 = vmul.f32 %v2759_v20, %v2757_v13  ;;  %v2761_v22 = vpop.eup %2760 }
 0x5b2   : > { %v972_v27 = vmul.f32 %v2761_v22, %v2755_v3 }
 0x5b3   : > { %2342 = vmatmul.mubr.msk.f32.vlgmr.msra.gmra.mrb[6].mxu1 %vm617_vm4, %v800_v21 }
 0x5b4   : > { %2473 = vmatpush3.bf16.msra.mxu1 %v2472_v23  ;;  %2355 = vmatprep.mubr.msk.f32.mxu1 %vm3035_vm0, %v3036_v1 }
 0x5b5   : > { %2474 = vmatprep.subr.bf16.mxu1 %v3034_v0 }
 0x5b7   : > { %2356 = vmatmul.mubr.msk.f32.vlgmr.msra.gmra.mrb[8].mxu1 %vm617_vm4, %v972_v27 }
 0x5b8   : > { %2362 = vmatprep.mubr.msk.f32.mxu1 %vm3035_vm0, %v3036_v1 }
 0x5bd   : > { %2477 = vmatpush3.bf16.xpose.msk.msra.mxu1 %vm3397_vm3, %v2475_v31 }
 0x5be   : > { %2485 = vmatprep.subr.bf16.mxu1 %v3034_v0 }
 0x5c4   : > { %2363 = vmatmul.mubr.msk.f32.vlgmr.msra.gmra.mrb[10].mxu1 %vm537_vm2, %v1053_v32 }
 0x5c5   : > { %2383 = vmatprep.mubr.msk.f32.mxu1 %vm3035_vm0, %v3036_v1 }
 0x686   : > { %v3464_v33 = vpop.f32.mrb[6].mxu1 }
 0x687   : > { %v2343_v34 = vpop.f32.mrb[7].mxu1 }
 0x68a   : > { %v3466_v35 = vpop.f32.mrb[8].mxu1 }
 0x68b   : > { %v2357_v36 = vpop.f32.mrb[9].mxu1 }
 0x697   : > { %v1130_v37 = vpop.f32.mrb[10].mxu1 }
 0x698   : > { %v2364_v38 = vpop.f32.mrb[11].mxu1  ;;  %v1134_v39 = vsel %vm617_vm4, %v1130_v37, -inf }
 0x699   : > { %1135 = vmax.xlane.f32.xlu0 %v1134_v39 }
 0x6af   : > { %2706 = vrot.lane.b32.xlu0 %v3401_v25, %s3043_s18  ;;  %s3673_s18 = sld [smem:[#allocation17_spill]] }
 0x6b3   : > { %1224 = vrot.lane.b32.xlu0 %v3410_v28, %s3044_s13 }
 0x726   : > { %v1136_v40 = vpop.xlane.xlu0 %1135 }
 0x727   : > { %v1137_v41 = vsub.f32 %v1130_v37, %v1136_v40 }
 0x729   : > { %v1138_v42 = vmul.f32 1.442695, %v1137_v41 }
 0x72a   : > { %v2707_v43 = vpop.permute.xlu0 %2706 }
 0x72b   : > { %2762 = vpow2.f32 %v1138_v42  ;;  %v2709_v44 = vunpack.i.h.bf16 %v2707_v43  ;;  %v2708_v45 = vunpack.i.l.bf16 %v2707_v43 }
 0x72d   : > { %v2479_v46 = vpack.c.bf16 %v2709_v44, %v2708_v45 }
 0x72e   : > { %v1225_v56 = vpop.permute.xlu0 %1224 }
 0x72f   : > { %2480 = vmatpush3.bf16.msra.mxu0 %v2479_v46 }
 0x730   : > { %2481 = vmatprep.subr.bf16.mxu0 %v3034_v0 }
 0x735   : > { %v2763_v47 = vpop.eup %2762 }
 0x736   : > { %v1140_v48 = vsel %vm617_vm4, %v2763_v47, 0.0 }
 0x737   : > { %1141 = vadd.xlane.f32.xlu1 %v1140_v48 }
 0x748   : > { %2711 = vrot.lane.b32.xlu1 %v3401_v25, %s3044_s13  ;;  %s352_s13 = sand.u32 1, %s3672_s1  }
 0x7c4   : > { %v1142_v49 = vpop.xlane.xlu1 %1141 }
 0x7c5   : > { %2764 = vrcp.f32 %v1142_v49 }
 0x7c8   : > { %v2712_v50 = vpop.permute.xlu1 %2711 }
 0x7c9   : > { %v2714_v51 = vunpack.i.h.bf16 %v2712_v50  ;;  %v2713_v52 = vunpack.i.l.bf16 %v2712_v50 }
 0x7cb   : > { %v2482_v55 = vpack.c.bf16 %v2714_v51, %v2713_v52 }
 0x7cf   : > { %v2765_v53 = vpop.eup %2764 }
 0x7d0   : > { %v1144_v54 = vmul.f32 %v2765_v53, %v2763_v47 }
 0x7d2   : > { %2370 = vmatmul.mubr.msk.f32.vlgmr.msra.gmra.mrb[6].mxu0 %vm617_vm4, %v1144_v54 }
 0x7d3   : > { %2484 = vmatpush3.bf16.xpose.msk.msra.mxu0 %vm3397_vm3, %v2482_v55  ;;  %2376 = vmatprep.mubr.msk.f32.mxu0 %vm3035_vm0, %v3036_v1 }
 0x7d4   : > { %2492 = vmatprep.subr.bf16.mxu0 %v3034_v0 }
 0x7da   : > { %2377 = vmatmul.mubr.msk.f32.vlgmr.msra.gmra.mrb[8].mxu0 %vm537_vm2, %v1225_v56 }
 0x7db   : > { %2397 = vmatprep.mubr.msk.f32.mxu0 %vm3035_vm0, %v3036_v1 }
 0x8a5   : > { %v3483_v57 = vpop.f32.mrb[6].mxu0 }
 0x8a6   : > { %v2371_v58 = vpop.f32.mrb[7].mxu0 }
 0x8ad   : > { %v1302_v59 = vpop.f32.mrb[8].mxu0 }
 0x8ae   : > { %v2378_v61 = vpop.f32.mrb[9].mxu0  ;;  %v1306_v62 = vsel %vm617_vm4, %v1302_v59, -inf }
 0x8af   : > { %1307 = vmax.xlane.f32.xlu1 %v1306_v62 }
 0x8c0   : > { %2721 = vrot.lane.b32.xlu1 %v3401_v25, %s3045_s20 }
 0x8c4   : > { %1396 = vrot.lane.b32.xlu1 %v3410_v28, %s3045_s20  ;;  %s2183_s20 = sshll.u32 %s352_s13, 3 }
 0x93c   : > { %v1308_v63 = vpop.xlane.xlu1 %1307 }
 0x93d   : > { %v1309_v2 = vsub.f32 %v1302_v59, %v1308_v63 }
 0x93f   : > { %v1310_v3 = vmul.f32 1.442695, %v1309_v2 }
 0x940   : > { %v2722_v11 = vpop.permute.xlu1 %2721 }
 0x941   : > { %2766 = vpow2.f32 %v1310_v3  ;;  %v2724_v13 = vunpack.i.h.bf16 %v2722_v11  ;;  %v2723_v14 = vunpack.i.l.bf16 %v2722_v11 }
 0x943   : > { %v2489_v17 = vpack.c.bf16 %v2724_v13, %v2723_v14 }
 0x944   : > { %v1397_v18 = vpop.permute.xlu1 %1396 }
 0x94b   : > { %v2767_v4 = vpop.eup %2766 }
 0x94c   : > { %v1312_v5 = vsel %vm617_vm4, %v2767_v4, 0.0 }
 0x94d   : > { %1313 = vadd.xlane.f32.xlu0 %v1312_v5 }
 0x963   : > { %2716 = vrot.lane.b32.xlu0 %v3401_v25, %s3046_s23  ;;  %s2225_s23 = sshll.u32 %s3673_s18, 1  ;;  %s3059_s18 = smov [#allocation10]  }
 0x9da   : > { %v1314_v6 = vpop.xlane.xlu0 %1313 }
 0x9db   : > { %2768 = vrcp.f32 %v1314_v6 }
 0x9de   : > { %v2717_v7 = vpop.permute.xlu0 %2716 }
 0x9df   : > { %v2719_v8 = vunpack.i.h.bf16 %v2717_v7  ;;  %v2718_v9 = vunpack.i.l.bf16 %v2717_v7 }
 0x9e1   : > { %v2486_v10 = vpack.c.bf16 %v2719_v8, %v2718_v9 }
 0x9e3   : > { %2487 = vmatpush3.bf16.msra.mxu1 %v2486_v10 }
 0x9e4   : > { %2488 = vmatprep.subr.bf16.mxu1 %v3034_v0 }
 0x9e5   : > { %v2769_v12 = vpop.eup %2768 }
 0x9e6   : > { %v1316_v15 = vmul.f32 %v2769_v12, %v2767_v4 }
 0x9e8   : > { %2384 = vmatmul.mubr.msk.f32.vlgmr.msra.gmra.mrb[12].mxu1 %vm617_vm4, %v1316_v15 }
 0x9e9   : > { %2390 = vmatprep.mubr.msk.f32.mxu1 %vm3035_vm0, %v3036_v1 }
 0x9ec   : > { %2491 = vmatpush3.bf16.xpose.msk.msra.mxu1 %vm3397_vm3, %v2489_v17 }
 0x9ed   : > { %2499 = vmatprep.subr.bf16.mxu1 %v3034_v0 }
 0x9f3   : > { %2391 = vmatmul.mubr.msk.f32.vlgmr.msra.gmra.mrb[14].mxu1 %vm537_vm2, %v1397_v18 }
 0x9f4   : > { %2411 = vmatprep.mubr.msk.f32.mxu1 %vm3035_vm0, %v3036_v1 }
 0xabb   : > { %v3500_v19 = vpop.f32.mrb[12].mxu1 }
 0xabc   : > { %v2385_v20 = vpop.f32.mrb[13].mxu1 }
 0xac6   : > { %v1474_v21 = vpop.f32.mrb[14].mxu1 }
 0xac7   : > { %v2392_v22 = vpop.f32.mrb[15].mxu1  ;;  %v1478_v23 = vsel %vm617_vm4, %v1474_v21, -inf }
 0xac8   : > { %1479 = vmax.xlane.f32.xlu0 %v1478_v23  ;;  %v1952_v22 = vld [vmem:[#allocation8] sm:$0xff]  ;;  %v1953_v23 = vld [vmem:[#allocation8 + $0x8] sm:$0xff] }
 0xade   : > { %2726 = vrot.lane.b32.xlu0 %v3401_v25, %s3047_s2  ;;  %s3674_s2 = sld [smem:[#allocation18_spill]] }
 0xae2   : > { %1568 = vrot.lane.b32.xlu0 %v3410_v28, %s3048_s14 }
 0xae4   : > { %p3677_p2 = scmp.ne.s32.totalorder %s3674_s2, 0 }
 0xb55   : > { %v1480_v26 = vpop.xlane.xlu0 %1479 }
 0xb56   : > { %v1481_v27 = vsub.f32 %v1474_v21, %v1480_v26  ;;  %v1954_v26 = vld [vmem:[#allocation8 + $0x10] sm:$0xff] }
 0xb58   : > { %v1482_v29 = vmul.f32 1.442695, %v1481_v27  ;;  %v2510_v27 = vpack.c.bf16 %v1953_v23, %v1952_v22 }
 0xb59   : > { %v2727_v30 = vpop.permute.xlu0 %2726 }
 0xb5a   : > { %2770 = vpow2.f32 %v1482_v29  ;;  %v2729_v31 = vunpack.i.h.bf16 %v2727_v30  ;;  %v2728_v32 = vunpack.i.l.bf16 %v2727_v30 }
 0xb5c   : > { %v2493_v34 = vpack.c.bf16 %v2729_v31, %v2728_v32 }
 0xb5d   : > { %v1569_v45 = vpop.permute.xlu0 %1568 }
 0xb5e   : > { %2494 = vmatpush3.bf16.msra.mxu0 %v2493_v34 }
 0xb5f   : > { %2495 = vmatprep.subr.bf16.mxu0 %v3034_v0 }
 0xb64   : > { %v2771_v36 = vpop.eup %2770 }
 0xb65   : > { %v1484_v37 = vsel %vm617_vm4, %v2771_v36, 0.0 }
 0xb66   : > { %1485 = vadd.xlane.f32.xlu1 %v1484_v37 }
 0xb77   : > { %2731 = vrot.lane.b32.xlu1 %v3401_v25, %s3048_s14  ;;  %s2050_s14 = sadd.s32 %s3010_s30, %s2225_s23  ;;  %s2039_s30 = scalar_lea.sflag [#allocation4], %s352_s13 }
 0xbf3   : > { %v1486_v38 = vpop.xlane.xlu1 %1485 }
 0xbf4   : > { %2772 = vrcp.f32 %v1486_v38 }
 0xbf7   : > { %v2732_v39 = vpop.permute.xlu1 %2731 }
 0xbf8   : > { %v2734_v40 = vunpack.i.h.bf16 %v2732_v39  ;;  %v2733_v41 = vunpack.i.l.bf16 %v2732_v39 }
 0xbfa   : > { %v2496_v44 = vpack.c.bf16 %v2734_v40, %v2733_v41 }
 0xbfe   : > { %v2773_v42 = vpop.eup %2772 }
 0xbff   : > { %v1488_v43 = vmul.f32 %v2773_v42, %v2771_v36 }
 0xc01   : > { %2398 = vmatmul.mubr.msk.f32.vlgmr.msra.gmra.mrb[10].mxu0 %vm617_vm4, %v1488_v43 }
 0xc02   : > { %2498 = vmatpush3.bf16.xpose.msk.msra.mxu0 %vm3397_vm3, %v2496_v44  ;;  %2404 = vmatprep.mubr.msk.f32.mxu0 %vm3035_vm0, %v3036_v1 }
 0xc03   : > { %2506 = vmatprep.subr.bf16.mxu0 %v3034_v0 }
 0xc09   : > { %2405 = vmatmul.mubr.msk.f32.vlgmr.msra.gmra.mrb[12].mxu0 %vm537_vm2, %v1569_v45 }
 0xc0a   : > { %2425 = vmatprep.mubr.msk.f32.mxu0 %vm3035_vm0, %v3036_v1 }
 0xcd4   : > { %v3517_v46 = vpop.f32.mrb[10].mxu0 }
 0xcd5   : > { %v2399_v47 = vpop.f32.mrb[11].mxu0 }
 0xcdc   : > { %v1646_v48 = vpop.f32.mrb[12].mxu0 }
 0xcdd   : > { %v2406_v49 = vpop.f32.mrb[13].mxu0  ;;  %v1650_v50 = vsel %vm617_vm4, %v1646_v48, -inf }
 0xcde   : > { %1651 = vmax.xlane.f32.xlu1 %v1650_v50 }
 0xcef   : > { %2741 = vrot.lane.b32.xlu1 %v3401_v25, %s3049_s16 }
 0xcf3   : > { %1740 = vrot.lane.b32.xlu1 %v3410_v28, %s3049_s16 }
 0xd6b   : > { %v1652_v51 = vpop.xlane.xlu1 %1651 }
 0xd6c   : > { %v1653_v52 = vsub.f32 %v1646_v48, %v1652_v51 }
 0xd6e   : > { %v1654_v53 = vmul.f32 1.442695, %v1653_v52 }
 0xd6f   : > { %v2742_v63 = vpop.permute.xlu1 %2741 }
 0xd70   : > { %2774 = vpow2.f32 %v1654_v53  ;;  %v2744_v2 = vunpack.i.h.bf16 %v2742_v63  ;;  %v2743_v3 = vunpack.i.l.bf16 %v2742_v63 }
 0xd72   : > { %v2503_v5 = vpack.c.bf16 %v2744_v2, %v2743_v3 }
 0xd73   : > { %v1741_v6 = vpop.permute.xlu1 %1740 }
 0xd7a   : > { %v2775_v54 = vpop.eup %2774 }
 0xd7b   : > { %v1656_v55 = vsel %vm617_vm4, %v2775_v54, 0.0 }
 0xd7c   : > { %1657 = vadd.xlane.f32.xlu0 %v1656_v55 }
 0xd92   : > { %2736 = vrot.lane.b32.xlu0 %v3401_v25, %s3050_s19 }
 0xe09   : > { %v1658_v56 = vpop.xlane.xlu0 %1657 }
 0xe0a   : > { %2776 = vrcp.f32 %v1658_v56 }
 0xe0d   : > { %v2737_v58 = vpop.permute.xlu0 %2736 }
 0xe0e   : > { %v2739_v59 = vunpack.i.h.bf16 %v2737_v58  ;;  %v2738_v61 = vunpack.i.l.bf16 %v2737_v58 }
 0xe10   : > { %v2500_v62 = vpack.c.bf16 %v2739_v59, %v2738_v61 }
 0xe12   : > { %2501 = vmatpush3.bf16.msra.mxu1 %v2500_v62 }
 0xe13   : > { %2502 = vmatprep.subr.bf16.mxu1 %v3034_v0 }
 0xe14   : > { %v2777_v28 = vpop.eup %2776 }
 0xe15   : > { %v1660_v4 = vmul.f32 %v2777_v28, %v2775_v54 }
 0xe17   : > { %2412 = vmatmul.mubr.msk.f32.vlgmr.msra.gmra.mrb[16].mxu1 %vm617_vm4, %v1660_v4 }
 0xe18   : > { %2418 = vmatprep.mubr.msk.f32.mxu1 %vm3035_vm0, %v3036_v1 }
 0xe1b   : > { %2505 = vmatpush3.bf16.xpose.msk.msra.mxu1 %vm3397_vm3, %v2503_v5 }
 0xe22   : > { %2419 = vmatmul.mubr.msk.f32.vlgmr.msra.gmra.mrb[18].mxu1 %vm537_vm2, %v1741_v6 }
 0xeea   : > { %v1736_v7 = vpop.f32.mrb[16].mxu1 }
 0xeeb   : > { %v2413_v8 = vpop.f32.mrb[17].mxu1 }
 0xef5   : > { %v1818_v9 = vpop.f32.mrb[18].mxu1 }
 0xef6   : > { %v2420_v10 = vpop.f32.mrb[19].mxu1  ;;  %v1822_v11 = vsel %vm617_vm4, %v1818_v9, -inf }
 0xef7   : > { %1823 = vmax.xlane.f32.xlu0 %v1822_v11 }
 0xf0d   : > { %2746 = vrot.lane.b32.xlu0 %v3401_v25, %s3051_s15  ;;  %s3675_s15 = sld [smem:[#allocation23_spill]] }
 0xf11   : > { %1917 = vrot.lane.b32.xlu0 %v3466_v35, %s3052_s25  ;;  %s2226_s25 = sshll.u32 %s2050_s14, 7 }
 0xf15   : > { %1925 = vrot.lane.b32.xlu0 %v3500_v19, %s3053_s8  ;;  %s354_s8 = scalar_lea.vmem [#allocation10], %s2183_s20  ;;  %s2900_s20 = sshll.u32 %s3059_s18, 4  ;;  %s2901_s20 = int_to_ptr.vmem [resolvable:$false] %s2900_s20 }
 0xf16   : > { %s2902_s23 = scalar_lea.vmem %s2901_s20, 256 }
 0xf19   : > { %1933 = vrot.lane.b32.xlu0 %v1736_v7, %s3054_s17  ;;  %s2054_s17 = sshll.u32 %s354_s8, 4  ;;  %s3560_s17 = int_to_ptr.vmem [resolvable:$true] %s2054_s17 }
 0xf1a   : > { %s2896_s1 = scalar_lea.vmem %s3560_s17, 128  ;;  %p2903_p13 = scmp.lt.s32.totalorder %s3560_s17, %s2901_s20 }
 0xf1b   : > { %p2897_p10 = scmp.ne.s32.totalorder %s3560_s17, %s2896_s1  ;;  %p2904_p6 = scmp.lt.s32.totalorder %s2902_s23, %s2896_s1 }
 0xf1d   : > { %p2898_p9 = pnand %p2897_p10, %p3677_p2  ;;  %p2905_p8 = por %p2904_p6, %p2903_p13 }
 0xf1f   : > { %p2899_p5 = pneg %p2898_p9 }
 0xf21   : > { %p2906_p12 = pnand %p2905_p8, %p2899_p5 }
 0xf84   : > { %v1824_v24 = vpop.xlane.xlu0 %1823 }
 0xf85   : > { %v1825_v12 = vsub.f32 %v1818_v9, %v1824_v24 }
 0xf87   : > { %v1826_v13 = vmul.f32 1.442695, %v1825_v12 }
 0xf88   : > { %v2747_v14 = vpop.permute.xlu0 %2746 }
 0xf89   : > { %2778 = vpow2.f32 %v1826_v13  ;;  %v2749_v15 = vunpack.i.h.bf16 %v2747_v14  ;;  %v2748_v17 = vunpack.i.l.bf16 %v2747_v14 }
 0xf8b   : > { %v2507_v18 = vpack.c.bf16 %v2749_v15, %v2748_v17 }
 0xf8c   : > { %v1918_v32 = vpop.permute.xlu0 %1917 }
 0xf8d   : > { %2508 = vmatpush3.bf16.msra.mxu0 %v2507_v18 }
 0xf8e   : > { %2509 = vmatprep.subr.bf16.mxu0 %v3034_v0 }
 0xf90   : > { %v1926_v37 = vpop.permute.xlu0 %1925 }
 0xf93   : > { %v2779_v25 = vpop.eup %2778 }
 0xf94   : > { %v1828_v20 = vsel %vm617_vm4, %v2779_v25, 0.0  ;;  %v1934_v41 = vpop.permute.xlu0 %1933 }
 0xf95   : > { %1829 = vadd.xlane.f32.xlu1 %v1828_v20 }
 0xfa6   : > { %1913 = vrot.lane.b32.xlu1 %v3464_v33, %s3055_s12  ;;  %v1955_v33 = vld [vmem:[#allocation8 + $0x18] sm:$0xff] }
 0xfa7   : > { %v2513_v29 = vpack.c.bf16 %v1955_v33, %v1954_v26 }
 0xfaa   : > { %1921 = vrot.lane.b32.xlu1 %v3483_v57, %s3056_s21 }
 0xfae   : > { %1929 = vrot.lane.b32.xlu1 %v3517_v46, %s3057_s3  ;;  %s3676_s3 = sld [smem:[#allocation24_spill]] }
0x1022   : > { %v1830_v35 = vpop.xlane.xlu1 %1829 }
0x1023   : > { %2780 = vrcp.f32 %v1830_v35 }
0x1026   : > { %v1914_v31 = vpop.permute.xlu1 %1913 }
0x102a   : > { %v1922_v34 = vpop.permute.xlu1 %1921 }
0x102d   : > { %v2781_v19 = vpop.eup %2780 }
0x102e   : > { %v1832_v21 = vmul.f32 %v2781_v19, %v2779_v25 }
0x1030   : > { %2426 = vmatmul.mubr.msk.f32.vlgmr.msra.gmra.mrb[14].mxu0 %vm617_vm4, %v1832_v21 }
0x1031   : > { %2436 = vmatprep.mubr.msk.f32.mxu0 %vm3035_vm0, %v3036_v1  ;;  %2511 = vmatpush3.bf16.msra.mxu0 %v2510_v27  ;;  %v1940_v1 = vsel %vm537_vm2, %v3442_v60, %v1914_v31  ;;  %v2222_v60 = vld [vmem:[%s3675_s15] ss:$0 sm:$0xff] }
0x1032   : > { %2512 = vmatprep.subr.bf16.mxu0 %v3034_v0  ;;  %v1942_v36 = vsel %vm1941_vm5, %v1940_v1, %v1918_v32  ;;  %v1930_v0 = vpop.permute.xlu1 %1929 }
0x1033   : > { %v1944_v38 = vsel %vm1943_vm6, %v1942_v36, %v1922_v34 }
0x1034   : > { %v1945_v39 = vsel %vm617_vm4, %v1944_v38, %v1926_v37 }
0x1035   : > { %2514 = vmatpush3.bf16.msra.mxu0 %v2513_v29  ;;  %v1947_v40 = vsel %vm1946_vm7, %v1945_v39, %v1930_v0 }
0x1036   : > { %v1949_v42 = vsel %vm1948_vm8, %v1947_v40, %v1934_v41 }
0x1103   : > { %v1908_v57 = vpop.f32.mrb[14].mxu0 }
0x1104   : > { %1937 = vrot.lane.b32.xlu1 %v1908_v57, %s3058_s24  ;;  %v2427_v30 = vpop.f32.mrb[15].mxu0  ;;  %s3558_s24 = scalar_lea.hbm %s3676_s3, %s2226_s25 }
0x1176   : > { %v1938_v43 = vpop.permute.xlu1 %1937 }
0x1177   : > { %v1951_v44 = vsel %vm1950_vm9, %v1949_v42, %v1938_v43 }
0x1178   : > { %2437 = vmatmul.mubr.msk.f32.vlgmr.msra.gmra.mrb[16].mxu0 %vm371_vm1, %v1951_v44 }
0x124b   : > { %v2032_v45 = vpop.f32.mrb[16].mxu0 }
0x124c   : > { %v2033_v46 = vadd.f32 %v2222_v60, %v2032_v45  ;;  %v2438_v47 = vpop.f32.mrb[17].mxu0 }
0x124e   : > { %v2036_v48 = vadd.f32 %v2033_v46, %v3381_v16 }
0x1250   : > { %2037 = vst.msk [vmem:[%s354_s8] sm:$0xff] %vm371_vm1, %v2036_v48 }
0x1251   : > { %2909 = shalt.err (!%p2906_p12)
}
0x1252   : > { %s2910_s13 = scalar_lea.hbm %s3558_s24, 128  ;;  %s2914_s19 = scalar_lea.hbm %s3676_s3, 512 }
0x1253   : > { %p2911_p4 = scmp.ne.s32.totalorder %s3558_s24, %s2910_s13  ;;  %p2915_p0 = scmp.lt.u32.totalorder %s3558_s24, %s3676_s3 }
0x1254   : > { %p2916_p1 = scmp.lt.u32.totalorder %s2914_s19, %s2910_s13  ;;  %p2918_p10 = scmp.lt.u32.totalorder %s2910_s13, %s3558_s24 }
0x1255   : > { %p2912_p7 = pnand %p2911_p4, %p3677_p2 }
0x1256   : > { %p2917_p11 = por %p2916_p1, %p2915_p0 }
0x1257   : > { %p2913_p3 = pneg %p2912_p7 }
0x1258   : > { %p2919_p9 = por %p2918_p10, %p2917_p11 }
0x125a   : > { %p2920_p5 = pnand %p2919_p9, %p2913_p3 }
0x125c   : > { %2923 = shalt.err (!%p2920_p5)
}
0x125d   : > { %2529 = dma.vmem_to_hbm [thread:$0]  (%p3677_p2), %s3560_s17, 128, %s3558_s24, %s2039_s30  }
0x125e PF: > { %s3678_s8 = sld [smem:[#allocation15_spill]]  ;;  %s3679_s12 = sld [smem:[#allocation19_spill]] }
0x125f   : > { %p2556_p13 = scmp.ge.s32.totalorder %s3026_s11, 2 }
0x1264   : > { %s2066_s21 = sand.u32 1, %s3678_s8   ;;  %p3680_p6 = scmp.ne.s32.totalorder %s3679_s12, 0 }
0x1265   : > { %s2067_s1 = scalar_lea.sflag [#allocation4], %s2066_s21 }
0x1266   : > { %p2546_p8 = pnand %p2556_p13, %p3680_p6 }
0x1268   : > { %2981 = dma.done.wait (!%p2546_p8), %s2067_s1, 128  }
0x1269   : > { %2983 = vsyncadd (!%p2546_p8), %s2067_s1, 4294967168  ;;  %s25_s11 = sadd.s32 1, %s3026_s11   ;;  %s3681_s24 = sld [smem:[#allocation16_spill]] }
0x126a   : > { %p22_p12 = scmp.ge.s32.totalorder %s25_s11, 6   ;;  %s3682_s25 = smov %s2994_s26 }
0x126b   : > { %s3683_s26 = smov %s3307_s27  ;;  %s3684_s27 = smov %s3002_s28 }
0x126c   : > { %s3685_s28 = smov %s3006_s29  ;;  %s3686_s29 = smov %s3302_s7 }
0x126d   : > { %s3687_s30 = smov %s3018_s9  ;;  %s3688_s8 = smov %s3022_s10 }
0x126e   : > { %s3689_s9 = smov %s3692_s6  ;;  %s3690_s10 = smov %s3696_s22 }
0x126f   :  { %24 = sbr.rel (!%p22_p12) target bundleno = 17 (0x11), region = 106 }
0x1276   :  { %2072 = vsyncpa [#allocation3], 1 }
0x1277   :  { %2074 = vsyncpa [#allocation3 + $0x1], 1 }
0x1278   :  { %2075 = vsyncpa [#allocation6], 1 }
0x1279   :  { %2076 = vsyncpa [#allocation9], 1 }
0x127a   :  { %2077 = vsyncpa [#allocation4], 1 }
0x127b   :  { %2079 = vsyncpa [#allocation4 + $0x1], 1 }

</bundles_post_ra>
